<compile_context>
chip_gen: v6e
topology: v6e:2x2x1
jax: 0.10.0
libtpu: 0.0.40
codegen_flags: <defaults>
</compile_context>

<pallas_src>
import functools

import jax
import jax.numpy as jnp
from jax.experimental import pallas as pl
from jax.experimental.pallas import tpu as pltpu


# ----------------------------------------------------------------------------
# Pallas kernel: 5 fused matmuls (BN folded, encoder head folded into decoder).
# Activations are (C, tm): channels on sublanes, pixels on lanes.
# refs = (w1, b1, w2, b2, ..., w5, b5, o_ref); relu_flags is static.
# ----------------------------------------------------------------------------
def featcae_kernel(x_ref, *refs, relu_flags):
    o_ref = refs[-1]
    h = x_ref[...].astype(jnp.bfloat16)          # f32 -> bf16 cast in-kernel
    for li, relu in enumerate(relu_flags):
        w_ref = refs[2 * li]
        b_ref = refs[2 * li + 1]
        # bf16 MXU inputs, f32 accumulation; bias add + ReLU in f32.
        y = jnp.dot(w_ref[...], h, preferred_element_type=jnp.float32) + b_ref[...]
        if relu:
            h = jnp.maximum(y, 0.0).astype(jnp.bfloat16)   # bf16 between layers
        else:
            h = y                                          # final layer stays f32
    o_ref[...] = h.astype(o_ref.dtype)


def _round_up(v, m):
    return ((v + m - 1) // m) * m


# ----------------------------------------------------------------------------
# Wrapper: NCHW f32 in, NCHW bf16 out.  No host-side transpose / cast / pad.
# ----------------------------------------------------------------------------
@functools.partial(jax.jit, static_argnames=("relu_flags", "tm", "out_dtype"))
def featcae_forward_nchw(x_nchw, params, relu_flags, tm=1024,
                         out_dtype=jnp.bfloat16):
    n, c, hgt, wid = x_nchw.shape
    hw = hgt * wid
    c_out = params[-1][0].shape[0]

    # Lane-dense pixel tile: multiple of 128, no larger than the pixel count.
    tm_eff = min(tm, _round_up(hw, 128))
    # v7x megacore: ensure >= 2 parallel grid blocks when possible.
    if n * pl.cdiv(hw, tm_eff) < 2 and hw > 128:
        tm_eff = _round_up(pl.cdiv(hw, 2), 128)

    x3 = x_nchw.reshape(n, c, hw)                # f32, no pad, no cast

    in_specs = [pl.BlockSpec((None, c, tm_eff), lambda i, j: (i, 0, j))]
    flat_params = []
    for (w, b) in params:
        # Whole-array VMEM residency: DMA'd once, single-buffered across the grid.
        in_specs.append(pl.BlockSpec(memory_space=pltpu.MemorySpace.VMEM))
        in_specs.append(pl.BlockSpec(memory_space=pltpu.MemorySpace.VMEM))
        flat_params += [w, b]

    y3 = pl.pallas_call(
        functools.partial(featcae_kernel, relu_flags=relu_flags),
        out_shape=jax.ShapeDtypeStruct((n, c_out, hw), out_dtype),
        grid=(n, pl.cdiv(hw, tm_eff)),
        in_specs=in_specs,
        out_specs=pl.BlockSpec((None, c_out, tm_eff), lambda i, j: (i, 0, j)),
        compiler_params=pltpu.CompilerParams(
            dimension_semantics=("parallel", "parallel")),
    )(x3, *flat_params)

    return y3.reshape(n, c_out, hgt, wid)


# ----------------------------------------------------------------------------
# Synthetic parameters matching the PyTorch FeatCAE layer sequence (all f32).
# ----------------------------------------------------------------------------
def make_featcae_raw_params(key, in_channels, latent_dim, is_bn=True):
    mid = (in_channels + 2 * latent_dim) // 2
    lat2 = 2 * latent_dim
    dims = [
        (in_channels, mid, is_bn),
        (mid, lat2, is_bn),
        (lat2, latent_dim, False),      # encoder head: no BN / no ReLU
        (latent_dim, lat2, is_bn),
        (lat2, mid, is_bn),
        (mid, in_channels, False),      # decoder head: no BN / no ReLU
    ]
    raw = []
    for (cin, cout, has_bn) in dims:
        key, kw, kb, kg, kbe, km, kv = jax.random.split(key, 7)
        w = jax.random.normal(kw, (cout, cin), jnp.float32) * 0.05
        b = jax.random.normal(kb, (cout,), jnp.float32) * 0.05
        bn = None
        if has_bn:
            bn = (1.0 + 0.1 * jax.random.normal(kg, (cout,), jnp.float32),      # gamma
                  0.1 * jax.random.normal(kbe, (cout,), jnp.float32),           # beta
                  0.1 * jax.random.normal(km, (cout,), jnp.float32),            # running mean
                  jnp.abs(jax.random.normal(kv, (cout,), jnp.float32)) + 0.5)   # running var
        raw.append((w, b, bn))
    return raw


# ----------------------------------------------------------------------------
# BN fold + encoder-head fold (both in f32), channel padding, bf16 weight cast.
# Returns 5 (w, b) pairs and their static ReLU flags.
# ----------------------------------------------------------------------------
def fold_featcae_params(raw, eps=1e-5, pad_to=128):
    # 1) inference-mode BN folded into each conv (f32).
    folded = []
    for (w, b, bn) in raw:
        if bn is not None:
            gamma, beta, mean, var = bn
            s = gamma / jnp.sqrt(var + eps)
            w = w * s[:, None]
            b = (b - mean) * s + beta
        folded.append((w, b))

    # 2) layer 3 (purely linear) folded into (BN-folded) decoder layer 4:
    #      W34 = W4 @ W3,  b34 = W4 @ b3 + b4     (exact up to the bf16 cast)
    w3, b3 = folded[2]
    w4, b4 = folded[3]
    fused = [folded[0], folded[1], (w4 @ w3, w4 @ b3 + b4), folded[4], folded[5]]
    relu_flags = (True, True, True, True, False)

    # 3) zero-pad intermediate channel dims to MXU-aligned sizes.  First Cin /
    #    last Cout must stay at the real channel counts (match input / output).
    params = []
    last = len(fused) - 1
    for li, (w, b) in enumerate(fused):
        cout, cin = w.shape
        cin_p = cin if li == 0 else _round_up(cin, pad_to)
        cout_p = cout if li == last else _round_up(cout, pad_to)
        w_p = jnp.zeros((cout_p, cin_p), jnp.float32).at[:cout, :cin].set(w)
        b_p = jnp.zeros((cout_p, 1), jnp.float32).at[:cout, 0].set(b)
        params.append((w_p.astype(jnp.bfloat16), b_p))
    return params, relu_flags


# ----------------------------------------------------------------------------
# References: pure-f32 semantic reference (PyTorch-equivalent math) and a
# mixed-precision reference that mirrors the kernel's bf16/f32 path.
# ----------------------------------------------------------------------------
def featcae_ref_f32(x_nchw, raw, eps=1e-5):
    n, c, hgt, wid = x_nchw.shape
    h = x_nchw.reshape(n, c, hgt * wid)
    relu = (True, True, False, True, True, False)
    for (w, b, bn), r in zip(raw, relu):
        y = jnp.einsum("oc,ncp->nop", w, h) + b[None, :, None]
        if bn is not None:
            gamma, beta, mean, var = bn
            s = gamma / jnp.sqrt(var + eps)
            y = (y - mean[None, :, None]) * s[None, :, None] + beta[None, :, None]
        h = jnp.maximum(y, 0.0) if r else y
    c_out = raw[-1][0].shape[0]
    return h.reshape(n, c_out, hgt, wid)


def featcae_ref_mixed(x_nchw, params, relu_flags):
    n, c, hgt, wid = x_nchw.shape
    h = x_nchw.reshape(n, c, hgt * wid).astype(jnp.bfloat16)
    for (w, b), r in zip(params, relu_flags):
        y = jnp.einsum("oc,ncp->nop", w, h,
                       preferred_element_type=jnp.float32) + b[None]
        h = jnp.maximum(y, 0.0).astype(jnp.bfloat16) if r else y
    c_out = params[-1][0].shape[0]
    return h.astype(jnp.bfloat16).reshape(n, c_out, hgt, wid)


if __name__ == "__main__":
    # Small shapes consistent with FeatCAE (defaults 1000/50, scaled down).
    IN_CHANNELS = 128
    LATENT_DIM = 16
    N, H, W = 2, 16, 16            # H*W = 256 pixels -> one lane-dense tile each

    key = jax.random.PRNGKey(0)
    key, kx = jax.random.split(key)
    x = jax.random.normal(kx, (N, IN_CHANNELS, H, W), jnp.float32)

    raw = make_featcae_raw_params(key, IN_CHANNELS, LATENT_DIM, is_bn=True)
    params, relu_flags = fold_featcae_params(raw)

    y = featcae_forward_nchw(x, params, relu_flags=relu_flags, tm=1024)
    y = jax.block_until_ready(y)
    assert y.shape == (N, IN_CHANNELS, H, W)
    assert y.dtype == jnp.bfloat16

    # Tight check vs a reference that uses the kernel's exact bf16/f32 math.
    y_mixed = featcae_ref_mixed(x, params, relu_flags)
    err_mixed = jnp.max(jnp.abs(y.astype(jnp.float32) - y_mixed.astype(jnp.float32)))
    assert float(err_mixed) < 2e-2, f"mismatch vs mixed-precision ref: {float(err_mixed)}"

    # Looser semantic check vs the pure-f32 (PyTorch-equivalent) reference.
    y_ref = featcae_ref_f32(x, raw)
    err = jnp.abs(y.astype(jnp.float32) - y_ref)
    tol = 0.1 + 0.05 * jnp.abs(y_ref)
    assert bool(jnp.all(err <= tol)), (
        f"mismatch vs f32 reference: max_err={float(jnp.max(err)):.4f}")

    print("KERNEL_OK")
</pallas_src>

<mosaic_0001>
module attributes {stable_mosaic.version = 11 : i64} {
  func.func @featcae_kernel(%arg0: i32, %arg1: i32, %arg2: memref<1x128x256xf32, #tpu.memory_space<vmem>>, %arg3: memref<128x128xbf16, #tpu.memory_space<vmem>>, %arg4: memref<128x1xf32, #tpu.memory_space<vmem>>, %arg5: memref<128x128xbf16, #tpu.memory_space<vmem>>, %arg6: memref<128x1xf32, #tpu.memory_space<vmem>>, %arg7: memref<128x128xbf16, #tpu.memory_space<vmem>>, %arg8: memref<128x1xf32, #tpu.memory_space<vmem>>, %arg9: memref<128x128xbf16, #tpu.memory_space<vmem>>, %arg10: memref<128x1xf32, #tpu.memory_space<vmem>>, %arg11: memref<128x128xbf16, #tpu.memory_space<vmem>>, %arg12: memref<128x1xf32, #tpu.memory_space<vmem>>, %arg13: memref<1x128x256xbf16, #tpu.memory_space<vmem>>) attributes {dimension_semantics = [#tpu.dimension_semantics<parallel>, #tpu.dimension_semantics<parallel>], iteration_bounds = array<i64: 2, 1>, scalar_prefetch = 0 : i64, scratch_operands = 0 : i64, tpu.core_type = #tpu.core_type<tc>, window_params = [{transform_indices = @transform_0, window_bounds = array<i64: 1, 128, 256>}, {pipeline_mode = #tpu.pipeline_mode<synchronous>, transform_indices = @transform_1, window_bounds = array<i64: 128, 128>}, {pipeline_mode = #tpu.pipeline_mode<synchronous>, transform_indices = @transform_2, window_bounds = array<i64: 128, 1>}, {pipeline_mode = #tpu.pipeline_mode<synchronous>, transform_indices = @transform_3, window_bounds = array<i64: 128, 128>}, {pipeline_mode = #tpu.pipeline_mode<synchronous>, transform_indices = @transform_4, window_bounds = array<i64: 128, 1>}, {pipeline_mode = #tpu.pipeline_mode<synchronous>, transform_indices = @transform_5, window_bounds = array<i64: 128, 128>}, {pipeline_mode = #tpu.pipeline_mode<synchronous>, transform_indices = @transform_6, window_bounds = array<i64: 128, 1>}, {pipeline_mode = #tpu.pipeline_mode<synchronous>, transform_indices = @transform_7, window_bounds = array<i64: 128, 128>}, {pipeline_mode = #tpu.pipeline_mode<synchronous>, transform_indices = @transform_8, window_bounds = array<i64: 128, 1>}, {pipeline_mode = #tpu.pipeline_mode<synchronous>, transform_indices = @transform_9, window_bounds = array<i64: 128, 128>}, {pipeline_mode = #tpu.pipeline_mode<synchronous>, transform_indices = @transform_10, window_bounds = array<i64: 128, 1>}, {transform_indices = @transform_11, window_bounds = array<i64: 1, 128, 256>}]} {
    %c0 = arith.constant 0 : index
    %c0_0 = arith.constant 0 : index
    %c0_1 = arith.constant 0 : index
    %0 = vector.load %arg2[%c0, %c0_0, %c0_1] : memref<1x128x256xf32, #tpu.memory_space<vmem>>, vector<1x128x256xf32>
    %1 = vector.shape_cast %0 : vector<1x128x256xf32> to vector<128x256xf32>
    %2 = arith.truncf %1 : vector<128x256xf32> to vector<128x256xbf16>
    %c0_2 = arith.constant 0 : index
    %c0_3 = arith.constant 0 : index
    %3 = vector.load %arg3[%c0_2, %c0_3] : memref<128x128xbf16, #tpu.memory_space<vmem>>, vector<128x128xbf16>
    %cst = arith.constant dense<0.000000e+00> : vector<128x256xf32>
    %4 = tpu.matmul %3, %2, %cst {dimension_numbers = #tpu.dot_dimension_numbers<[1], [0], [0], [1], [0, 0, 1, 1], [], []>} : vector<128x128xbf16>, vector<128x256xbf16>, vector<128x256xf32> -> vector<128x256xf32>
    %c0_4 = arith.constant 0 : index
    %c0_5 = arith.constant 0 : index
    %5 = vector.load %arg4[%c0_4, %c0_5] : memref<128x1xf32, #tpu.memory_space<vmem>>, vector<128x1xf32>
    %6 = vector.broadcast %5 : vector<128x1xf32> to vector<128x256xf32>
    %7 = arith.addf %4, %6 : vector<128x256xf32>
    %cst_6 = arith.constant 0.000000e+00 : f32
    %8 = vector.broadcast %cst_6 : f32 to vector<128x256xf32>
    %9 = arith.maximumf %7, %8 : vector<128x256xf32>
    %10 = arith.truncf %9 : vector<128x256xf32> to vector<128x256xbf16>
    %c0_7 = arith.constant 0 : index
    %c0_8 = arith.constant 0 : index
    %11 = vector.load %arg5[%c0_7, %c0_8] : memref<128x128xbf16, #tpu.memory_space<vmem>>, vector<128x128xbf16>
    %cst_9 = arith.constant dense<0.000000e+00> : vector<128x256xf32>
    %12 = tpu.matmul %11, %10, %cst_9 {dimension_numbers = #tpu.dot_dimension_numbers<[1], [0], [0], [1], [0, 0, 1, 1], [], []>} : vector<128x128xbf16>, vector<128x256xbf16>, vector<128x256xf32> -> vector<128x256xf32>
    %c0_10 = arith.constant 0 : index
    %c0_11 = arith.constant 0 : index
    %13 = vector.load %arg6[%c0_10, %c0_11] : memref<128x1xf32, #tpu.memory_space<vmem>>, vector<128x1xf32>
    %14 = vector.broadcast %13 : vector<128x1xf32> to vector<128x256xf32>
    %15 = arith.addf %12, %14 : vector<128x256xf32>
    %cst_12 = arith.constant 0.000000e+00 : f32
    %16 = vector.broadcast %cst_12 : f32 to vector<128x256xf32>
    %17 = arith.maximumf %15, %16 : vector<128x256xf32>
    %18 = arith.truncf %17 : vector<128x256xf32> to vector<128x256xbf16>
    %c0_13 = arith.constant 0 : index
    %c0_14 = arith.constant 0 : index
    %19 = vector.load %arg7[%c0_13, %c0_14] : memref<128x128xbf16, #tpu.memory_space<vmem>>, vector<128x128xbf16>
    %cst_15 = arith.constant dense<0.000000e+00> : vector<128x256xf32>
    %20 = tpu.matmul %19, %18, %cst_15 {dimension_numbers = #tpu.dot_dimension_numbers<[1], [0], [0], [1], [0, 0, 1, 1], [], []>} : vector<128x128xbf16>, vector<128x256xbf16>, vector<128x256xf32> -> vector<128x256xf32>
    %c0_16 = arith.constant 0 : index
    %c0_17 = arith.constant 0 : index
    %21 = vector.load %arg8[%c0_16, %c0_17] : memref<128x1xf32, #tpu.memory_space<vmem>>, vector<128x1xf32>
    %22 = vector.broadcast %21 : vector<128x1xf32> to vector<128x256xf32>
    %23 = arith.addf %20, %22 : vector<128x256xf32>
    %cst_18 = arith.constant 0.000000e+00 : f32
    %24 = vector.broadcast %cst_18 : f32 to vector<128x256xf32>
    %25 = arith.maximumf %23, %24 : vector<128x256xf32>
    %26 = arith.truncf %25 : vector<128x256xf32> to vector<128x256xbf16>
    %c0_19 = arith.constant 0 : index
    %c0_20 = arith.constant 0 : index
    %27 = vector.load %arg9[%c0_19, %c0_20] : memref<128x128xbf16, #tpu.memory_space<vmem>>, vector<128x128xbf16>
    %cst_21 = arith.constant dense<0.000000e+00> : vector<128x256xf32>
    %28 = tpu.matmul %27, %26, %cst_21 {dimension_numbers = #tpu.dot_dimension_numbers<[1], [0], [0], [1], [0, 0, 1, 1], [], []>} : vector<128x128xbf16>, vector<128x256xbf16>, vector<128x256xf32> -> vector<128x256xf32>
    %c0_22 = arith.constant 0 : index
    %c0_23 = arith.constant 0 : index
    %29 = vector.load %arg10[%c0_22, %c0_23] : memref<128x1xf32, #tpu.memory_space<vmem>>, vector<128x1xf32>
    %30 = vector.broadcast %29 : vector<128x1xf32> to vector<128x256xf32>
    %31 = arith.addf %28, %30 : vector<128x256xf32>
    %cst_24 = arith.constant 0.000000e+00 : f32
    %32 = vector.broadcast %cst_24 : f32 to vector<128x256xf32>
    %33 = arith.maximumf %31, %32 : vector<128x256xf32>
    %34 = arith.truncf %33 : vector<128x256xf32> to vector<128x256xbf16>
    %c0_25 = arith.constant 0 : index
    %c0_26 = arith.constant 0 : index
    %35 = vector.load %arg11[%c0_25, %c0_26] : memref<128x128xbf16, #tpu.memory_space<vmem>>, vector<128x128xbf16>
    %cst_27 = arith.constant dense<0.000000e+00> : vector<128x256xf32>
    %36 = tpu.matmul %35, %34, %cst_27 {dimension_numbers = #tpu.dot_dimension_numbers<[1], [0], [0], [1], [0, 0, 1, 1], [], []>} : vector<128x128xbf16>, vector<128x256xbf16>, vector<128x256xf32> -> vector<128x256xf32>
    %c0_28 = arith.constant 0 : index
    %c0_29 = arith.constant 0 : index
    %37 = vector.load %arg12[%c0_28, %c0_29] : memref<128x1xf32, #tpu.memory_space<vmem>>, vector<128x1xf32>
    %38 = vector.broadcast %37 : vector<128x1xf32> to vector<128x256xf32>
    %39 = arith.addf %36, %38 : vector<128x256xf32>
    %40 = arith.truncf %39 : vector<128x256xf32> to vector<128x256xbf16>
    %c0_30 = arith.constant 0 : index
    %c0_31 = arith.constant 0 : index
    %c0_32 = arith.constant 0 : index
    %41 = vector.load %arg13[%c0_30, %c0_31, %c0_32] : memref<1x128x256xbf16, #tpu.memory_space<vmem>>, vector<1x128x256xbf16>
    %42 = vector.shape_cast %41 : vector<1x128x256xbf16> to vector<128x256xbf16>
    %43 = vector.shape_cast %40 : vector<128x256xbf16> to vector<1x128x256xbf16>
    tpu.vector_store %arg13[%c0_30, %c0_31, %c0_32], %43 {strides = array<i32>} : memref<1x128x256xbf16, #tpu.memory_space<vmem>>, vector<1x128x256xbf16>,
    return
  }
  func.func @transform_0(%arg0: i32, %arg1: i32) -> (i32, i32, i32) {
    %c0_i32 = arith.constant 0 : i32
    %c0_i32_0 = arith.constant 0 : i32
    return %arg0, %c0_i32, %arg1 : i32, i32, i32
  }
  func.func @transform_1(%arg0: i32, %arg1: i32) -> (i32, i32) {
    %c0_i32 = arith.constant 0 : i32
    %c0_i32_0 = arith.constant 0 : i32
    %c0_i32_1 = arith.constant 0 : i32
    return %c0_i32, %c0_i32_0 : i32, i32
  }
  func.func @transform_2(%arg0: i32, %arg1: i32) -> (i32, i32) {
    %c0_i32 = arith.constant 0 : i32
    %c0_i32_0 = arith.constant 0 : i32
    %c0_i32_1 = arith.constant 0 : i32
    return %c0_i32, %c0_i32_0 : i32, i32
  }
  func.func @transform_3(%arg0: i32, %arg1: i32) -> (i32, i32) {
    %c0_i32 = arith.constant 0 : i32
    %c0_i32_0 = arith.constant 0 : i32
    %c0_i32_1 = arith.constant 0 : i32
    return %c0_i32, %c0_i32_0 : i32, i32
  }
  func.func @transform_4(%arg0: i32, %arg1: i32) -> (i32, i32) {
    %c0_i32 = arith.constant 0 : i32
    %c0_i32_0 = arith.constant 0 : i32
    %c0_i32_1 = arith.constant 0 : i32
    return %c0_i32, %c0_i32_0 : i32, i32
  }
  func.func @transform_5(%arg0: i32, %arg1: i32) -> (i32, i32) {
    %c0_i32 = arith.constant 0 : i32
    %c0_i32_0 = arith.constant 0 : i32
    %c0_i32_1 = arith.constant 0 : i32
    return %c0_i32, %c0_i32_0 : i32, i32
  }
  func.func @transform_6(%arg0: i32, %arg1: i32) -> (i32, i32) {
    %c0_i32 = arith.constant 0 : i32
    %c0_i32_0 = arith.constant 0 : i32
    %c0_i32_1 = arith.constant 0 : i32
    return %c0_i32, %c0_i32_0 : i32, i32
  }
  func.func @transform_7(%arg0: i32, %arg1: i32) -> (i32, i32) {
    %c0_i32 = arith.constant 0 : i32
    %c0_i32_0 = arith.constant 0 : i32
    %c0_i32_1 = arith.constant 0 : i32
    return %c0_i32, %c0_i32_0 : i32, i32
  }
  func.func @transform_8(%arg0: i32, %arg1: i32) -> (i32, i32) {
    %c0_i32 = arith.constant 0 : i32
    %c0_i32_0 = arith.constant 0 : i32
    %c0_i32_1 = arith.constant 0 : i32
    return %c0_i32, %c0_i32_0 : i32, i32
  }
  func.func @transform_9(%arg0: i32, %arg1: i32) -> (i32, i32) {
    %c0_i32 = arith.constant 0 : i32
    %c0_i32_0 = arith.constant 0 : i32
    %c0_i32_1 = arith.constant 0 : i32
    return %c0_i32, %c0_i32_0 : i32, i32
  }
  func.func @transform_10(%arg0: i32, %arg1: i32) -> (i32, i32) {
    %c0_i32 = arith.constant 0 : i32
    %c0_i32_0 = arith.constant 0 : i32
    %c0_i32_1 = arith.constant 0 : i32
    return %c0_i32, %c0_i32_0 : i32, i32
  }
  func.func @transform_11(%arg0: i32, %arg1: i32) -> (i32, i32, i32) {
    %c0_i32 = arith.constant 0 : i32
    %c0_i32_0 = arith.constant 0 : i32
    return %arg0, %c0_i32, %arg1 : i32, i32, i32
  }
}

</mosaic_0001>

<bundles_post_ra>
// kernel: featcae_forward_nchw.1
= control target key start
LH: loop header
LB: loop body
LE: loop exit
PB: predicated region body
PF: predicated region fallthrough
CT: control target
= control target key end

     0   :  { %s2484_s17 = smov 0   ;;  %s2486_s18 = smov 0   ;;  %s3248_s0 = inlined_call_operand.vmem [shape: f32[2,128,256], index: 0, kind: input, shape index: {}]   ;;  %s3249_s1 = inlined_call_operand.vmem [shape: bf16[128,128], index: 1, kind: input, shape index: {}]   ;;  %s3250_s2 = inlined_call_operand.vmem [shape: f32[128,1], index: 2, kind: input, shape index: {}]   ;;  %s3251_s3 = inlined_call_operand.vmem [shape: bf16[128,128], index: 3, kind: input, shape index: {}]   ;;  %s3252_s4 = inlined_call_operand.vmem [shape: f32[128,1], index: 4, kind: input, shape index: {}]   ;;  %s3253_s5 = inlined_call_operand.vmem [shape: bf16[128,128], index: 5, kind: input, shape index: {}]   ;;  %s3254_s6 = inlined_call_operand.vmem [shape: f32[128,1], index: 6, kind: input, shape index: {}]   ;;  %s3255_s7 = inlined_call_operand.vmem [shape: bf16[128,128], index: 7, kind: input, shape index: {}]   ;;  %s3256_s8 = inlined_call_operand.vmem [shape: f32[128,1], index: 8, kind: input, shape index: {}]   ;;  %s3257_s9 = inlined_call_operand.vmem [shape: bf16[128,128], index: 9, kind: input, shape index: {}]   ;;  %s3258_s10 = inlined_call_operand.vmem [shape: f32[128,1], index: 10, kind: input, shape index: {}]   ;;  %s3259_s11 = inlined_call_operand.vmem [shape: bf16[2,128,256], index: 11, kind: output, shape index: {}]  }
   0x1   :  { %s2488_s19 = smov 0  }
   0x2 LB: > { %s33_s20 = sadd.s32 1, %s2417_s18  ;;  %p2235_p0 = scmp.ge.s32.totalorder %s2421_s19, 1  ;;  %s2421_s19 = sphi %s2488_s19, %s21_s19   ;;  %s2417_s18 = sphi %s2486_s18, %s3261_s18   ;;  %s2413_s17 = sphi %s2484_s17, %s3260_s17  }
   0x3   : > { %p35_p1 = scmp.ge.s32.totalorder %s33_s20, 2  ;;  %p358_p2 = scmp.lt.s32.totalorder %s2421_s19, 3 }
   0x5   : > { %s3263_s20 = smov (%p35_p1, %s33_s20), 0  ;;  %p359_p3 = pnand %p2235_p0, %p358_p2 }
   0x6   : > { %p407_p4 = scmp.lt.s32.totalorder (!%p359_p3), %s2413_s17, 1 }
   0x7   : > { %362 = sbr.rel (%p359_p3) target bundleno = 1451 (0x5ab), region = 64 }
   0xc   : > { %v505_v0 = vld [vmem:[%s3250_s2 + $0x70] sm:$0xff]  ;;  %v503_v1 = vld [vmem:[%s3250_s2 + $0x60] sm:$0xff]  ;;  %v2423_v2 = vmov 0   ;;  %s3265_s17 = smov (!%p407_p4, %s2413_s17), 1  ;;  %v506_v3 = vld [vmem:[%s3250_s2 + $0x78] sm:$0xff] }
   0xd   : > { %2358 = vset.pattern.permute.xlu1 %v2423_v2  ;;  %2357 = vset.pattern.permute.xlu0 %v2423_v2  ;;  %v504_v4 = vld [vmem:[%s3250_s2 + $0x68] sm:$0xff]  ;;  %s2298_s29 = sshll.u32 %s3265_s17, 8  ;;  %v502_v5 = vld [vmem:[%s3250_s2 + $0x58] sm:$0xff]  ;;  %v501_v6 = vld [vmem:[%s3250_s2 + $0x50] sm:$0xff]  ;;  %s2299_s26 = sshll.u32 %s3265_s17, 7 }
   0xe   : > { %579 = vperm.xlu0 %2357, %v505_v0   ;;  %569 = vperm.xlu1 %2358, %v503_v1   ;;  %s2524_s13 = scalar_lea.vmem %s3248_s0, %s2298_s29  ;;  %v500_v20 = vld [vmem:[%s3250_s2 + $0x48] sm:$0xff]  ;;  %v499_v21 = vld [vmem:[%s3250_s2 + $0x40] sm:$0xff]  ;;  %v498_v28 = vld [vmem:[%s3250_s2 + $0x38] sm:$0xff]  ;;  %s3221_s29 = scalar_lea.vmem %s3259_s11, %s2299_s26 }
   0xf   : > { %667 = vmatprep.mubr.bf16.mxu0 %v2423_v2  ;;  %707 = vmatprep.mubr.bf16.mxu1 %v2423_v2  ;;  %v456_v7 = vld [vmem:[%s2524_s13 + $0xe8] sm:$0xff]  ;;  %v458_v8 = vld [vmem:[%s2524_s13 + $0xf8] sm:$0xff]  ;;  %v455_v9 = vld [vmem:[%s2524_s13 + $0xe0] sm:$0xff] }
  0x10   : > { %v474_v10 = vpack.c.bf16 %v458_v8, %v456_v7  ;;  %v457_v11 = vld [vmem:[%s2524_s13 + $0xf0] sm:$0xff]  ;;  %v452_v12 = vld [vmem:[%s2524_s13 + $0xc8] sm:$0xff]  ;;  %v454_v13 = vld [vmem:[%s2524_s13 + $0xd8] sm:$0xff] }
  0x11   : > { %v473_v14 = vpack.c.bf16 %v457_v11, %v455_v9  ;;  %v472_v15 = vpack.c.bf16 %v454_v13, %v452_v12  ;;  %v451_v16 = vld [vmem:[%s2524_s13 + $0xc0] sm:$0xff]  ;;  %v453_v17 = vld [vmem:[%s2524_s13 + $0xd0] sm:$0xff]  ;;  %v448_v18 = vld [vmem:[%s2524_s13 + $0xa8] sm:$0xff] }
  0x12   : > { %584 = vperm.xlu0 %2357, %v506_v3   ;;  %574 = vperm.xlu1 %2358, %v504_v4   ;;  %v450_v19 = vld [vmem:[%s2524_s13 + $0xb8] sm:$0xff]  ;;  %v471_v22 = vpack.c.bf16 %v453_v17, %v451_v16  ;;  %v447_v24 = vld [vmem:[%s2524_s13 + $0xa0] sm:$0xff]  ;;  %v449_v25 = vld [vmem:[%s2524_s13 + $0xb0] sm:$0xff] }
  0x13   : > { %635 = vmatprep.subr.bf16.mxu0 %v474_v10  ;;  %2316 = vmatprep.subr.bf16.mxu1 %v474_v10  ;;  %v470_v23 = vpack.c.bf16 %v450_v19, %v448_v18  ;;  %v444_v26 = vld [vmem:[%s2524_s13 + $0x88] sm:$0xff]  ;;  %v446_v27 = vld [vmem:[%s2524_s13 + $0x98] sm:$0xff]  ;;  %v497_v29 = vld [vmem:[%s3250_s2 + $0x30] sm:$0xff]  ;;  %v469_v30 = vpack.c.bf16 %v449_v25, %v447_v24 }
  0x14   : > { %636 = vmatpush1.bf16.msra.mxu0 %v473_v14  ;;  %2324 = vmatpush1.bf16.msra.mxu1 %v473_v14  ;;  %v468_v31 = vpack.c.bf16 %v446_v27, %v444_v26  ;;  %v443_v32 = vld [vmem:[%s2524_s13 + $0x80] sm:$0xff]  ;;  %v445_v33 = vld [vmem:[%s2524_s13 + $0x90] sm:$0xff]  ;;  %v440_v34 = vld [vmem:[%s2524_s13 + $0x68] sm:$0xff] }
  0x15   : > { %637 = vmatprep.subr.bf16.mxu0 %v472_v15  ;;  %2317 = vmatprep.subr.bf16.mxu1 %v472_v15  ;;  %v442_v35 = vld [vmem:[%s2524_s13 + $0x78] sm:$0xff]  ;;  %v496_v36 = vld [vmem:[%s3250_s2 + $0x28] sm:$0xff]  ;;  %v495_v37 = vld [vmem:[%s3250_s2 + $0x20] sm:$0xff]  ;;  %v467_v38 = vpack.c.bf16 %v445_v33, %v443_v32 }
  0x16   : > { %564 = vperm.xlu1 %2358, %v502_v5   ;;  %559 = vperm.xlu0 %2357, %v501_v6   ;;  %v439_v39 = vld [vmem:[%s2524_s13 + $0x60] sm:$0xff]  ;;  %v466_v40 = vpack.c.bf16 %v442_v35, %v440_v34  ;;  %v441_v41 = vld [vmem:[%s2524_s13 + $0x70] sm:$0xff]  ;;  %v436_v42 = vld [vmem:[%s2524_s13 + $0x48] sm:$0xff] }
  0x17   : > { %v438_v43 = vld [vmem:[%s2524_s13 + $0x58] sm:$0xff]  ;;  %v493_v45 = vld [vmem:[%s3250_s2 + $0x10] sm:$0xff]  ;;  %v465_v46 = vpack.c.bf16 %v441_v41, %v439_v39  ;;  %v435_v47 = vld [vmem:[%s2524_s13 + $0x40] sm:$0xff] }
  0x18   : > { %638 = vmatpush1.bf16.msra.mxu0 %v471_v22  ;;  %2325 = vmatpush1.bf16.msra.mxu1 %v471_v22  ;;  %v494_v44 = vld [vmem:[%s3250_s2 + $0x18] sm:$0xff]  ;;  %v437_v48 = vld [vmem:[%s2524_s13 + $0x50] sm:$0xff]  ;;  %v464_v49 = vpack.c.bf16 %v438_v43, %v436_v42  ;;  %v432_v50 = vld [vmem:[%s2524_s13 + $0x28] sm:$0xff] }
  0x19   : > { %639 = vmatprep.subr.bf16.mxu0 %v470_v23  ;;  %2318 = vmatprep.subr.bf16.mxu1 %v470_v23  ;;  %v434_v51 = vld [vmem:[%s2524_s13 + $0x38] sm:$0xff]  ;;  %v492_v52 = vld [vmem:[%s3250_s2 + $0x8] sm:$0xff]  ;;  %v491_v53 = vld [vmem:[%s3250_s2] sm:$0xff]  ;;  %v463_v54 = vpack.c.bf16 %v437_v48, %v435_v47 }
  0x1a   : > { %554 = vperm.xlu1 %2358, %v500_v20   ;;  %549 = vperm.xlu0 %2357, %v499_v21   ;;  %v431_v55 = vld [vmem:[%s2524_s13 + $0x20] sm:$0xff]  ;;  %v462_v56 = vpack.c.bf16 %v434_v51, %v432_v50  ;;  %v433_v57 = vld [vmem:[%s2524_s13 + $0x30] sm:$0xff]  ;;  %v428_v58 = vld [vmem:[%s2524_s13 + $0x8] sm:$0xff] }
  0x1b   : > { %v430_v59 = vld [vmem:[%s2524_s13 + $0x18] sm:$0xff]  ;;  %v826_v61 = vld [vmem:[%s3252_s4 + $0x70] sm:$0xff]  ;;  %v461_v62 = vpack.c.bf16 %v433_v57, %v431_v55  ;;  %v427_v0 = vld [vmem:[%s2524_s13] sm:$0xff] }
  0x1c   : > { %640 = vmatpush1.bf16.msra.mxu0 %v469_v30  ;;  %2326 = vmatpush1.bf16.msra.mxu1 %v469_v30  ;;  %v827_v60 = vld [vmem:[%s3252_s4 + $0x78] sm:$0xff]  ;;  %v460_v63 = vpack.c.bf16 %v430_v59, %v428_v58  ;;  %v429_v1 = vld [vmem:[%s2524_s13 + $0x10] sm:$0xff]  ;;  %v825_v3 = vld [vmem:[%s3252_s4 + $0x68] sm:$0xff] }
  0x1d   : > { %641 = vmatprep.subr.bf16.mxu0 %v468_v31  ;;  %2319 = vmatprep.subr.bf16.mxu1 %v468_v31  ;;  %v824_v4 = vld [vmem:[%s3252_s4 + $0x60] sm:$0xff]  ;;  %v459_v5 = vpack.c.bf16 %v429_v1, %v427_v0  ;;  %v823_v8 = vld [vmem:[%s3252_s4 + $0x58] sm:$0xff]  ;;  %v822_v9 = vld [vmem:[%s3252_s4 + $0x50] sm:$0xff] }
  0x1e   : > { %544 = vperm.xlu1 %2358, %v498_v28   ;;  %539 = vperm.xlu0 %2357, %v497_v29   ;;  %v2359_v6 = vld [vmem:[%s3249_s1] sm:$0xff]   ;;  %v821_v10 = vld [vmem:[%s3252_s4 + $0x48] sm:$0xff]  ;;  %v819_v14 = vld [vmem:[%s3252_s4 + $0x38] sm:$0xff] }
  0x1f   : > { %v2360_v7 = vld [vmem:[%s3249_s1 + $0x20] sm:$0xff]   ;;  %v2361_v12 = vld [vmem:[%s3249_s1 + $0x8] sm:$0xff]   ;;  %v818_v15 = vld [vmem:[%s3252_s4 + $0x30] sm:$0xff] }
  0x20   : > { %642 = vmatpush1.bf16.msra.mxu0 %v467_v38  ;;  %2327 = vmatpush1.bf16.msra.mxu1 %v467_v38  ;;  %v820_v11 = vld [vmem:[%s3252_s4 + $0x40] sm:$0xff]  ;;  %v2362_v13 = vld [vmem:[%s3249_s1 + $0x28] sm:$0xff]   ;;  %v2363_v18 = vld [vmem:[%s3249_s1 + $0x10] sm:$0xff]  }
  0x21   : > { %643 = vmatprep.subr.bf16.mxu0 %v466_v40  ;;  %2320 = vmatprep.subr.bf16.mxu1 %v466_v40  ;;  %v817_v16 = vld [vmem:[%s3252_s4 + $0x28] sm:$0xff]  ;;  %v816_v17 = vld [vmem:[%s3252_s4 + $0x20] sm:$0xff]  ;;  %v2364_v19 = vld [vmem:[%s3249_s1 + $0x30] sm:$0xff]  }
  0x22   : > { %534 = vperm.xlu1 %2358, %v496_v36   ;;  %529 = vperm.xlu0 %2357, %v495_v37   ;;  %v815_v20 = vld [vmem:[%s3252_s4 + $0x18] sm:$0xff]  ;;  %v814_v21 = vld [vmem:[%s3252_s4 + $0x10] sm:$0xff]  ;;  %v813_v22 = vld [vmem:[%s3252_s4 + $0x8] sm:$0xff] }
  0x23   : > { %v812_v23 = vld [vmem:[%s3252_s4] sm:$0xff]  ;;  %v2365_v24 = vld [vmem:[%s3249_s1 + $0x18] sm:$0xff]   ;;  %v1147_v27 = vld [vmem:[%s3254_s6 + $0x70] sm:$0xff] }
  0x24   : > { %644 = vmatpush1.bf16.msra.mxu0 %v465_v46  ;;  %2328 = vmatpush1.bf16.msra.mxu1 %v465_v46  ;;  %v2366_v25 = vld [vmem:[%s3249_s1 + $0x38] sm:$0xff]   ;;  %v1146_v28 = vld [vmem:[%s3254_s6 + $0x68] sm:$0xff]  ;;  %v1145_v29 = vld [vmem:[%s3254_s6 + $0x60] sm:$0xff] }
  0x25   : > { %645 = vmatprep.subr.bf16.mxu0 %v464_v49  ;;  %2321 = vmatprep.subr.bf16.mxu1 %v464_v49  ;;  %v1148_v26 = vld [vmem:[%s3254_s6 + $0x78] sm:$0xff]  ;;  %v1143_v31 = vld [vmem:[%s3254_s6 + $0x50] sm:$0xff]  ;;  %v1142_v32 = vld [vmem:[%s3254_s6 + $0x48] sm:$0xff] }
  0x26   : > { %524 = vperm.xlu1 %2358, %v494_v44   ;;  %519 = vperm.xlu0 %2357, %v493_v45   ;;  %v1144_v30 = vld [vmem:[%s3254_s6 + $0x58] sm:$0xff]  ;;  %v1141_v33 = vld [vmem:[%s3254_s6 + $0x40] sm:$0xff]  ;;  %v1139_v35 = vld [vmem:[%s3254_s6 + $0x30] sm:$0xff] }
  0x27   : > { %v1140_v34 = vld [vmem:[%s3254_s6 + $0x38] sm:$0xff]  ;;  %v1138_v36 = vld [vmem:[%s3254_s6 + $0x28] sm:$0xff]  ;;  %v1137_v37 = vld [vmem:[%s3254_s6 + $0x20] sm:$0xff] }
  0x28   : > { %646 = vmatpush1.bf16.msra.mxu0 %v463_v54  ;;  %2329 = vmatpush1.bf16.msra.mxu1 %v463_v54  ;;  %v1136_v38 = vld [vmem:[%s3254_s6 + $0x18] sm:$0xff]  ;;  %v1135_v39 = vld [vmem:[%s3254_s6 + $0x10] sm:$0xff]  ;;  %v1134_v40 = vld [vmem:[%s3254_s6 + $0x8] sm:$0xff] }
  0x29   : > { %647 = vmatprep.subr.bf16.mxu0 %v462_v56  ;;  %2322 = vmatprep.subr.bf16.mxu1 %v462_v56  ;;  %v1133_v41 = vld [vmem:[%s3254_s6] sm:$0xff]  ;;  %v1469_v42 = vld [vmem:[%s3256_s8 + $0x78] sm:$0xff]  ;;  %v1468_v43 = vld [vmem:[%s3256_s8 + $0x70] sm:$0xff] }
  0x2a   : > { %514 = vperm.xlu1 %2358, %v492_v52   ;;  %509 = vperm.xlu0 %2357, %v491_v53   ;;  %v1467_v44 = vld [vmem:[%s3256_s8 + $0x68] sm:$0xff]  ;;  %v1466_v45 = vld [vmem:[%s3256_s8 + $0x60] sm:$0xff]  ;;  %v1465_v46 = vld [vmem:[%s3256_s8 + $0x58] sm:$0xff] }
  0x2b   : > { %v1464_v47 = vld [vmem:[%s3256_s8 + $0x50] sm:$0xff]  ;;  %v1463_v48 = vld [vmem:[%s3256_s8 + $0x48] sm:$0xff]  ;;  %v1462_v49 = vld [vmem:[%s3256_s8 + $0x40] sm:$0xff] }
  0x2c   : > { %648 = vmatpush1.bf16.msra.mxu0 %v461_v62  ;;  %2330 = vmatpush1.bf16.msra.mxu1 %v461_v62  ;;  %v1461_v50 = vld [vmem:[%s3256_s8 + $0x38] sm:$0xff]  ;;  %v1460_v51 = vld [vmem:[%s3256_s8 + $0x30] sm:$0xff]  ;;  %v1459_v52 = vld [vmem:[%s3256_s8 + $0x28] sm:$0xff] }
  0x2d   : > { %649 = vmatprep.subr.bf16.mxu0 %v460_v63  ;;  %2323 = vmatprep.subr.bf16.mxu1 %v460_v63  ;;  %v1458_v53 = vld [vmem:[%s3256_s8 + $0x20] sm:$0xff]  ;;  %v1457_v54 = vld [vmem:[%s3256_s8 + $0x18] sm:$0xff]  ;;  %v1456_v55 = vld [vmem:[%s3256_s8 + $0x10] sm:$0xff] }
  0x2e   : > { %905 = vperm.xlu1 %2358, %v827_v60   ;;  %900 = vperm.xlu0 %2357, %v826_v61   ;;  %v1455_v56 = vld [vmem:[%s3256_s8 + $0x8] sm:$0xff]  ;;  %v1454_v57 = vld [vmem:[%s3256_s8] sm:$0xff]  ;;  %v1778_v60 = vld [vmem:[%s3258_s10 + $0x18] sm:$0xff] }
  0x2f   : > { %v1776_v58 = vld [vmem:[%s3258_s10 + $0x8] sm:$0xff]  ;;  %v1775_v59 = vld [vmem:[%s3258_s10] sm:$0xff]  ;;  %v1777_v61 = vld [vmem:[%s3258_s10 + $0x10] sm:$0xff] }
  0x30   : > { %650 = vmatpush1.bf16.msra.mxu0 %v459_v5  ;;  %2331 = vmatpush1.bf16.msra.mxu1 %v459_v5  ;;  %v1780_v62 = vld [vmem:[%s3258_s10 + $0x28] sm:$0xff]  ;;  %v1779_v63 = vld [vmem:[%s3258_s10 + $0x20] sm:$0xff]  ;;  %v1782_v0 = vld [vmem:[%s3258_s10 + $0x38] sm:$0xff] }
  0x31   : > { %v1781_v1 = vld [vmem:[%s3258_s10 + $0x30] sm:$0xff]  ;;  %v1786_v5 = vld [vmem:[%s3258_s10 + $0x58] sm:$0xff] }
  0x32   : > { %895 = vperm.xlu1 %2358, %v825_v3   ;;  %890 = vperm.xlu0 %2357, %v824_v4   ;;  %v1784_v3 = vld [vmem:[%s3258_s10 + $0x48] sm:$0xff]  ;;  %v1783_v4 = vld [vmem:[%s3258_s10 + $0x40] sm:$0xff] }
  0x33   : > { %668 = vmatmul.mubr.bf16.vlgmr.msra.gmra.mxu0 %v2359_v6  ;;  %708 = vmatmul.mubr.bf16.vlgmr.msra.gmra.mxu1 %v2360_v7  ;;  %v1785_v6 = vld [vmem:[%s3258_s10 + $0x50] sm:$0xff]  ;;  %v1788_v7 = vld [vmem:[%s3258_s10 + $0x68] sm:$0xff] }
  0x34   : > { %677 = vmatprep.mubr.bf16.mxu0 %v2423_v2  ;;  %717 = vmatprep.mubr.bf16.mxu1 %v2423_v2 }
  0x36   : > { %885 = vperm.xlu1 %2358, %v823_v8   ;;  %880 = vperm.xlu0 %2357, %v822_v9   ;;  %v1787_v8 = vld [vmem:[%s3258_s10 + $0x60] sm:$0xff]  ;;  %v1790_v9 = vld [vmem:[%s3258_s10 + $0x78] sm:$0xff] }
  0x3a   : > { %875 = vperm.xlu1 %2358, %v821_v10   ;;  %870 = vperm.xlu0 %2357, %v820_v11   ;;  %v1789_v10 = vld [vmem:[%s3258_s10 + $0x70] sm:$0xff] }
  0x3b   : > { %678 = vmatmul.mubr.bf16.gmra.mxu0 %v2361_v12  ;;  %718 = vmatmul.mubr.bf16.gmra.mxu1 %v2362_v13 }
  0x3c   : > { %687 = vmatprep.mubr.bf16.mxu0 %v2423_v2  ;;  %727 = vmatprep.mubr.bf16.mxu1 %v2423_v2 }
  0x3e   : > { %865 = vperm.xlu1 %2358, %v819_v14   ;;  %860 = vperm.xlu0 %2357, %v818_v15  }
  0x42   : > { %855 = vperm.xlu1 %2358, %v817_v16   ;;  %850 = vperm.xlu0 %2357, %v816_v17  }
  0x43   : > { %688 = vmatmul.mubr.bf16.gmra.mxu0 %v2363_v18  ;;  %728 = vmatmul.mubr.bf16.gmra.mxu1 %v2364_v19 }
  0x44   : > { %697 = vmatprep.mubr.bf16.mxu0 %v2423_v2  ;;  %737 = vmatprep.mubr.bf16.mxu1 %v2423_v2 }
  0x46   : > { %845 = vperm.xlu1 %2358, %v815_v20   ;;  %840 = vperm.xlu0 %2357, %v814_v21  }
  0x4a   : > { %835 = vperm.xlu1 %2358, %v813_v22   ;;  %830 = vperm.xlu0 %2357, %v812_v23  }
  0x4b   : > { %698 = vmatmul.mubr.bf16.gmra.mxu0 %v2365_v24  ;;  %738 = vmatmul.mubr.bf16.gmra.mxu1 %v2366_v25 }
  0x4c   : > { %988 = vmatprep.mubr.bf16.mxu1 %v2423_v2  ;;  %1309 = vmatprep.mubr.bf16.mxu0 %v2423_v2 }
  0x4e   : > { %1226 = vperm.xlu1 %2358, %v1148_v26   ;;  %1221 = vperm.xlu0 %2357, %v1147_v27  }
  0x52   : > { %1216 = vperm.xlu1 %2358, %v1146_v28   ;;  %1211 = vperm.xlu0 %2357, %v1145_v29  }
  0x56   : > { %1206 = vperm.xlu1 %2358, %v1144_v30   ;;  %1201 = vperm.xlu0 %2357, %v1143_v31  }
  0x5a   : > { %1196 = vperm.xlu1 %2358, %v1142_v32   ;;  %1191 = vperm.xlu0 %2357, %v1141_v33  }
  0x5e   : > { %1186 = vperm.xlu1 %2358, %v1140_v34   ;;  %1181 = vperm.xlu0 %2357, %v1139_v35  }
  0x62   : > { %1176 = vperm.xlu1 %2358, %v1138_v36   ;;  %1171 = vperm.xlu0 %2357, %v1137_v37  }
  0x66   : > { %1166 = vperm.xlu1 %2358, %v1136_v38   ;;  %1161 = vperm.xlu0 %2357, %v1135_v39  }
  0x6a   : > { %1156 = vperm.xlu1 %2358, %v1134_v40   ;;  %1151 = vperm.xlu0 %2357, %v1133_v41  }
  0x6e   : > { %1547 = vperm.xlu1 %2358, %v1469_v42   ;;  %1542 = vperm.xlu0 %2357, %v1468_v43  }
  0x72   : > { %1537 = vperm.xlu1 %2358, %v1467_v44   ;;  %1532 = vperm.xlu0 %2357, %v1466_v45  }
  0x76   : > { %1527 = vperm.xlu1 %2358, %v1465_v46   ;;  %1522 = vperm.xlu0 %2357, %v1464_v47  }
  0x7a   : > { %1517 = vperm.xlu1 %2358, %v1463_v48   ;;  %1512 = vperm.xlu0 %2357, %v1462_v49  }
  0x7e   : > { %1507 = vperm.xlu1 %2358, %v1461_v50   ;;  %1502 = vperm.xlu0 %2357, %v1460_v51  }
  0x82   : > { %1497 = vperm.xlu1 %2358, %v1459_v52   ;;  %1492 = vperm.xlu0 %2357, %v1458_v53  }
  0x86   : > { %1487 = vperm.xlu1 %2358, %v1457_v54   ;;  %1482 = vperm.xlu0 %2357, %v1456_v55  }
  0x89   : > { %v580_v19 = vpop.permute.xlu0 %579  ;;  %v570_v22 = vpop.permute.xlu1 %569 }
  0x8a   : > { %1477 = vperm.xlu1 %2358, %v1455_v56   ;;  %1472 = vperm.xlu0 %2357, %v1454_v57  }
  0x8d   : > { %v585_v27 = vpop.permute.xlu0 %584  ;;  %v575_v30 = vpop.permute.xlu1 %574 }
  0x8e   : > { %1798 = vperm.xlu1 %2358, %v1776_v58   ;;  %1793 = vperm.xlu0 %2357, %v1775_v59  }
  0x91   : > { %v560_v35 = vpop.permute.xlu0 %559  ;;  %v565_v38 = vpop.permute.xlu1 %564 }
  0x92   : > { %1808 = vperm.xlu1 %2358, %v1778_v60   ;;  %1803 = vperm.xlu0 %2357, %v1777_v61  }
  0x95   : > { %v550_v42 = vpop.permute.xlu0 %549  ;;  %v555_v45 = vpop.permute.xlu1 %554 }
  0x96   : > { %1818 = vperm.xlu1 %2358, %v1780_v62   ;;  %1813 = vperm.xlu0 %2357, %v1779_v63  }
  0x99   : > { %v540_v55 = vpop.permute.xlu0 %539  ;;  %v545_v62 = vpop.permute.xlu1 %544 }
  0x9a   : > { %1828 = vperm.xlu1 %2358, %v1782_v0   ;;  %1823 = vperm.xlu0 %2357, %v1781_v1  }
  0x9e   : > { %1838 = vperm.xlu1 %2358, %v1784_v3   ;;  %1833 = vperm.xlu0 %2357, %v1783_v4  }
  0xa2   : > { %1848 = vperm.xlu1 %2358, %v1786_v5   ;;  %1843 = vperm.xlu0 %2357, %v1785_v6  }
  0xa6   : > { %1858 = vperm.xlu1 %2358, %v1788_v7   ;;  %1853 = vperm.xlu0 %2357, %v1787_v8  }
  0xaa   : > { %1868 = vperm.xlu1 %2358, %v1790_v9   ;;  %1863 = vperm.xlu0 %2357, %v1789_v10  }
  0xf3   : > { %v2818_v11 = vpop.f32.mrf.mxu0  ;;  %v2820_v12 = vpop.f32.mrf.mxu1 }
  0xf5   : > { %v2822_v13 = vpop.f32.mrf.mxu0  ;;  %v2824_v14 = vpop.f32.mrf.mxu1 }
  0xf7   : > { %v2826_v15 = vpop.f32.mrf.mxu0  ;;  %v2828_v16 = vpop.f32.mrf.mxu1 }
  0xf9   : > { %v2830_v17 = vpop.f32.mrf.mxu0  ;;  %v715_v18 = vpop.f32.mrf.mxu1 }
  0xfa   : > { %v716_v9 = vadd.f32 %v715_v18, %v555_v45 }
  0xfb   : > { %v2832_v20 = vpop.f32.mrf.mxu0  ;;  %v719_v21 = vpop.f32.mrf.mxu1 }
  0xfc   : > { %v767_v18 = vmax.f32 %v716_v9, 0.0 }
  0xfd   : > { %v2834_v23 = vpop.f32.mrf.mxu0  ;;  %v721_v24 = vpop.f32.mrf.mxu1 }
  0xfe   : > { %v722_v3 = vadd.f32 %v721_v24, %v560_v35  ;;  %v535_v24 = vpop.permute.xlu1 %534 }
  0xff   : > { %v2836_v25 = vpop.f32.mrf.mxu0  ;;  %v723_v26 = vpop.f32.mrf.mxu1 }
 0x100   : > { %v724_v6 = vadd.f32 %v723_v26, %v565_v38  ;;  %v710_v26 = vadd.f32 %v2820_v12, %v550_v42 }
 0x101   : > { %v2838_v28 = vpop.f32.mrf.mxu0  ;;  %v725_v29 = vpop.f32.mrf.mxu1 }
 0x102   : > { %v726_v58 = vadd.f32 %v725_v29, %v565_v38  ;;  %v770_v38 = vmax.f32 %v724_v6, 0.0 }
 0x103   : > { %v2840_v31 = vpop.f32.mrf.mxu0  ;;  %v729_v32 = vpop.f32.mrf.mxu1 }
 0x104   : > { %v730_v63 = vadd.f32 %v729_v32, %v570_v22  ;;  %v771_v10 = vmax.f32 %v726_v58, 0.0  ;;  %v769_v32 = vmax.f32 %v722_v3, 0.0 }
 0x105   : > { %v2842_v33 = vpop.f32.mrf.mxu0  ;;  %v731_v34 = vpop.f32.mrf.mxu1 }
 0x106   : > { %v732_v53 = vadd.f32 %v731_v34, %v570_v22  ;;  %v772_v29 = vmax.f32 %v730_v63, 0.0  ;;  %v714_v22 = vadd.f32 %v2828_v16, %v555_v45 }
 0x107   : > { %v2844_v36 = vpop.f32.mrf.mxu0  ;;  %v733_v37 = vpop.f32.mrf.mxu1 }
 0x108   : > { %v734_v56 = vadd.f32 %v733_v37, %v575_v30  ;;  %v773_v4 = vmax.f32 %v732_v53, 0.0  ;;  %v712_v37 = vadd.f32 %v2824_v14, %v550_v42  ;;  %v764_v14 = vmax.f32 %v710_v26, 0.0  ;;  %v2374_v26 = vld [vmem:[%s3251_s3 + $0x38] sm:$0xff]  }
 0x109   : > { %v2846_v39 = vpop.f32.mrf.mxu0  ;;  %v735_v40 = vpop.f32.mrf.mxu1  ;;  %v694_v58 = vadd.f32 %v2844_v36, %v535_v24 }
 0x10a   : > { %v736_v47 = vadd.f32 %v735_v40, %v575_v30  ;;  %v774_v7 = vmax.f32 %v734_v56, 0.0  ;;  %v720_v30 = vadd.f32 %v719_v21, %v560_v35  ;;  %v765_v21 = vmax.f32 %v712_v37, 0.0  ;;  %v2370_v37 = vld [vmem:[%s3251_s3 + $0x18] sm:$0xff]  }
 0x10b   : > { %v739_v41 = vpop.f32.mrf.mxu1  ;;  %v2848_v43 = vpop.f32.mrf.mxu0  ;;  %v766_v35 = vmax.f32 %v714_v22, 0.0  ;;  %v696_v12 = vadd.f32 %v2846_v39, %v535_v24  ;;  %v2371_v22 = vld [vmem:[%s3251_s3 + $0x20] sm:$0xff]   ;;  %v2373_v24 = vld [vmem:[%s3251_s3 + $0x30] sm:$0xff]  }
 0x10c   : > { %v740_v50 = vadd.f32 %v739_v41, %v580_v19  ;;  %v775_v59 = vmax.f32 %v736_v47, 0.0  ;;  %v792_v40 = vpack.c.bf16 %v774_v7, %v772_v29  ;;  %v791_v41 = vpack.c.bf16 %v771_v10, %v769_v32  ;;  %v2372_v32 = vld [vmem:[%s3251_s3 + $0x28] sm:$0xff]  }
 0x10d   : > { %v741_v44 = vpop.f32.mrf.mxu1  ;;  %v701_v51 = vpop.f32.mrf.mxu0  ;;  %v789_v45 = vpack.c.bf16 %v767_v18, %v765_v21  ;;  %v700_v53 = vadd.f32 %v2848_v43, %v540_v55 }
 0x10e   : > { %v742_v48 = vadd.f32 %v741_v44, %v580_v19  ;;  %v776_v0 = vmax.f32 %v740_v50, 0.0  ;;  %v793_v19 = vpack.c.bf16 %v775_v59, %v773_v4  ;;  %v702_v47 = vadd.f32 %v701_v51, %v540_v55 }
 0x10f   : > { %v743_v46 = vpop.f32.mrf.mxu1  ;;  %v703_v1 = vpop.f32.mrf.mxu0  ;;  %v760_v63 = vmax.f32 %v700_v53, 0.0 }
 0x110   : > { %v744_v49 = vadd.f32 %v743_v46, %v585_v27  ;;  %v777_v60 = vmax.f32 %v742_v48, 0.0  ;;  %v768_v46 = vmax.f32 %v720_v30, 0.0  ;;  %v704_v16 = vadd.f32 %v703_v1, %v545_v62 }
 0x111   : > { %v745_v52 = vpop.f32.mrf.mxu1  ;;  %v705_v34 = vpop.f32.mrf.mxu0  ;;  %v761_v56 = vmax.f32 %v702_v47, 0.0  ;;  %v758_v1 = vmax.f32 %v694_v58, 0.0 }
 0x112   : > { %v746_v54 = vadd.f32 %v745_v52, %v585_v27  ;;  %v778_v57 = vmax.f32 %v744_v49, 0.0  ;;  %v530_v27 = vpop.permute.xlu0 %529  ;;  %v706_v44 = vadd.f32 %v705_v34, %v545_v62  ;;  %v790_v49 = vpack.c.bf16 %v770_v38, %v768_v46  ;;  %v525_v52 = vpop.permute.xlu1 %524  ;;  %v2369_v34 = vld [vmem:[%s3251_s3 + $0x10] sm:$0xff]  }
 0x113   : > { %v692_v50 = vadd.f32 %v2842_v33, %v530_v27  ;;  %v762_v59 = vmax.f32 %v704_v16, 0.0 }
 0x114   : > { %v779_v61 = vmax.f32 %v746_v54, 0.0  ;;  %v794_v8 = vpack.c.bf16 %v778_v57, %v776_v0  ;;  %v763_v42 = vmax.f32 %v706_v44, 0.0  ;;  %v788_v54 = vpack.c.bf16 %v766_v35, %v764_v14 }
 0x115   : > { %v690_v57 = vadd.f32 %v2840_v31, %v530_v27  ;;  %v757_v33 = vmax.f32 %v692_v50, 0.0  ;;  %v786_v36 = vpack.c.bf16 %v762_v59, %v760_v63 }
 0x116   : > { %v795_v5 = vpack.c.bf16 %v779_v61, %v777_v60  ;;  %v520_v48 = vpop.permute.xlu0 %519  ;;  %v686_v60 = vadd.f32 %v2838_v28, %v525_v52  ;;  %v759_v61 = vmax.f32 %v696_v12, 0.0  ;;  %v787_v39 = vpack.c.bf16 %v763_v42, %v761_v56  ;;  %v515_v0 = vpop.permute.xlu1 %514 }
 0x117   : > { %v682_v51 = vadd.f32 %v2834_v23, %v520_v48  ;;  %v680_v55 = vadd.f32 %v2832_v20, %v520_v48  ;;  %v684_v23 = vadd.f32 %v2836_v25, %v525_v52  ;;  %v756_v31 = vmax.f32 %v690_v57, 0.0 }
 0x118   : > { %956 = vmatprep.subr.bf16.mxu1 %v795_v5  ;;  %v676_v3 = vadd.f32 %v2830_v17, %v515_v0  ;;  %v755_v4 = vmax.f32 %v686_v60, 0.0  ;;  %v785_v5 = vpack.c.bf16 %v759_v61, %v757_v33 }
 0x119   : > { %957 = vmatpush1.bf16.msra.mxu1 %v794_v8  ;;  %v753_v28 = vmax.f32 %v682_v51, 0.0  ;;  %v752_v7 = vmax.f32 %v680_v55, 0.0  ;;  %v754_v20 = vmax.f32 %v684_v23, 0.0  ;;  %v784_v8 = vpack.c.bf16 %v758_v1, %v756_v31 }
 0x11a   : > { %958 = vmatprep.subr.bf16.mxu1 %v793_v19  ;;  %v510_v62 = vpop.permute.xlu0 %509  ;;  %v751_v10 = vmax.f32 %v676_v3, 0.0 }
 0x11b   : > { %v672_v43 = vadd.f32 %v2822_v13, %v510_v62  ;;  %v670_v6 = vadd.f32 %v2818_v11, %v510_v62  ;;  %v674_v13 = vadd.f32 %v2826_v15, %v515_v0  ;;  %v783_v25 = vpack.c.bf16 %v755_v4, %v753_v28  ;;  %v2367_v11 = vld [vmem:[%s3251_s3] sm:$0xff]   ;;  %v2368_v15 = vld [vmem:[%s3251_s3 + $0x8] sm:$0xff]  }
 0x11c   : > { %v782_v17 = vpack.c.bf16 %v754_v20, %v752_v7 }
 0x11d   : > { %959 = vmatpush1.bf16.msra.mxu1 %v792_v40  ;;  %v749_v9 = vmax.f32 %v672_v43, 0.0  ;;  %v748_v19 = vmax.f32 %v670_v6, 0.0  ;;  %v750_v27 = vmax.f32 %v674_v13, 0.0  ;;  %v2900_v40 = vpop.permute.xlu1 %905 }
 0x11e   : > { %960 = vmatprep.subr.bf16.mxu1 %v791_v41  ;;  %v2898_v38 = vpop.permute.xlu0 %900 }
 0x11f   : > { %v781_v30 = vpack.c.bf16 %v751_v10, %v749_v9  ;;  %v780_v29 = vpack.c.bf16 %v750_v27, %v748_v19 }
 0x121   : > { %961 = vmatpush1.bf16.msra.mxu1 %v790_v49  ;;  %v2904_v41 = vpop.permute.xlu1 %895 }
 0x122   : > { %962 = vmatprep.subr.bf16.mxu1 %v789_v45  ;;  %v2902_v18 = vpop.permute.xlu0 %890 }
 0x125   : > { %963 = vmatpush1.bf16.msra.mxu1 %v788_v54  ;;  %v2908_v46 = vpop.permute.xlu1 %885 }
 0x126   : > { %964 = vmatprep.subr.bf16.mxu1 %v787_v39  ;;  %v2906_v44 = vpop.permute.xlu0 %880 }
 0x129   : > { %965 = vmatpush1.bf16.msra.mxu1 %v786_v36  ;;  %v2912_v35 = vpop.permute.xlu1 %875 }
 0x12a   : > { %966 = vmatprep.subr.bf16.mxu1 %v785_v5  ;;  %v2910_v21 = vpop.permute.xlu0 %870 }
 0x12d   : > { %967 = vmatpush1.bf16.msra.mxu1 %v784_v8  ;;  %v2916_v48 = vpop.permute.xlu1 %865 }
 0x12e   : > { %968 = vmatprep.subr.bf16.mxu1 %v783_v25  ;;  %v2914_v47 = vpop.permute.xlu0 %860 }
 0x131   : > { %969 = vmatpush1.bf16.msra.mxu1 %v782_v17  ;;  %v2920_v49 = vpop.permute.xlu1 %855 }
 0x132   : > { %970 = vmatprep.subr.bf16.mxu1 %v781_v30  ;;  %v2918_v14 = vpop.permute.xlu0 %850 }
 0x135   : > { %971 = vmatpush1.bf16.msra.mxu1 %v780_v29  ;;  %v846_v45 = vpop.permute.xlu1 %845 }
 0x136   : > { %v841_v16 = vpop.permute.xlu0 %840 }
 0x138   : > { %989 = vmatmul.mubr.bf16.vlgmr.msra.gmra.mxu1 %v2367_v11 }
 0x139   : > { %998 = vmatprep.mubr.bf16.mxu1 %v2423_v2  ;;  %v836_v53 = vpop.permute.xlu1 %835 }
 0x13a   : > { %v831_v12 = vpop.permute.xlu0 %830 }
 0x140   : > { %999 = vmatmul.mubr.bf16.gmra.mxu1 %v2368_v15 }
 0x141   : > { %1008 = vmatprep.mubr.bf16.mxu1 %v2423_v2 }
 0x148   : > { %1009 = vmatmul.mubr.bf16.gmra.mxu1 %v2369_v34 }
 0x149   : > { %1018 = vmatprep.mubr.bf16.mxu1 %v2423_v2 }
 0x150   : > { %1019 = vmatmul.mubr.bf16.gmra.mxu1 %v2370_v37 }
 0x151   : > { %1028 = vmatprep.mubr.bf16.mxu1 %v2423_v2 }
 0x158   : > { %1029 = vmatmul.mubr.bf16.gmra.mxu1 %v2371_v22 }
 0x159   : > { %1038 = vmatprep.mubr.bf16.mxu1 %v2423_v2 }
 0x160   : > { %1039 = vmatmul.mubr.bf16.gmra.mxu1 %v2372_v32 }
 0x161   : > { %1048 = vmatprep.mubr.bf16.mxu1 %v2423_v2 }
 0x168   : > { %1049 = vmatmul.mubr.bf16.gmra.mxu1 %v2373_v24 }
 0x169   : > { %1058 = vmatprep.mubr.bf16.mxu1 %v2423_v2 }
 0x170   : > { %1059 = vmatmul.mubr.bf16.gmra.mxu1 %v2374_v26 }
 0x171   : > { %1630 = vmatprep.mubr.bf16.mxu1 %v2423_v2 }
 0x1f8   : > { %v990_v50 = vpop.f32.mrf.mxu1 }
 0x1f9   : > { %v991_v52 = vadd.f32 %v990_v50, %v831_v12 }
 0x1fa   : > { %v992_v42 = vpop.f32.mrf.mxu1 }
 0x1fb   : > { %v993_v56 = vadd.f32 %v992_v42, %v831_v12  ;;  %v1069_v58 = vmax.f32 %v991_v52, 0.0 }
 0x1fc   : > { %v994_v54 = vpop.f32.mrf.mxu1 }
 0x1fd   : > { %v995_v51 = vadd.f32 %v994_v54, %v836_v53  ;;  %v1070_v61 = vmax.f32 %v993_v56, 0.0 }
 0x1fe   : > { %v996_v57 = vpop.f32.mrf.mxu1 }
 0x1ff   : > { %v1071_v59 = vmax.f32 %v995_v51, 0.0  ;;  %v997_v60 = vadd.f32 %v996_v57, %v836_v53 }
 0x200   : > { %v1000_v33 = vpop.f32.mrf.mxu1 }
 0x201   : > { %v2922_v39 = vpack.c.bf16 %v1071_v59, %v1069_v58  ;;  %v1072_v62 = vmax.f32 %v997_v60, 0.0  ;;  %v1001_v55 = vadd.f32 %v1000_v33, %v841_v16 }
 0x202   : > { %v1002_v63 = vpop.f32.mrf.mxu1 }
 0x203   : > { %v2924_v43 = vpack.c.bf16 %v1072_v62, %v1070_v61  ;;  %v1003_v23 = vadd.f32 %v1002_v63, %v841_v16  ;;  %v1073_v36 = vmax.f32 %v1001_v55, 0.0 }
 0x204   : > { %v1004_v0 = vpop.f32.mrf.mxu1 }
 0x205   : > { %v1005_v31 = vadd.f32 %v1004_v0, %v846_v45  ;;  %v1074_v5 = vmax.f32 %v1003_v23, 0.0 }
 0x206   : > { %v1006_v1 = vpop.f32.mrf.mxu1 }
 0x207   : > { %v1075_v3 = vmax.f32 %v1005_v31, 0.0  ;;  %v1007_v28 = vadd.f32 %v1006_v1, %v846_v45 }
 0x208   : > { %v2926_v4 = vpop.f32.mrf.mxu1 }
 0x209   : > { %v2928_v6 = vpack.c.bf16 %v1075_v3, %v1073_v36  ;;  %v1076_v13 = vmax.f32 %v1007_v28, 0.0 }
 0x20a   : > { %v2930_v7 = vpop.f32.mrf.mxu1 }
 0x20b   : > { %v2932_v20 = vpack.c.bf16 %v1076_v13, %v1074_v5 }
 0x20c   : > { %v2934_v8 = vpop.f32.mrf.mxu1 }
 0x20e   : > { %v2936_v9 = vpop.f32.mrf.mxu1 }
 0x210   : > { %v2938_v10 = vpop.f32.mrf.mxu1 }
 0x212   : > { %v1022_v25 = vpop.f32.mrf.mxu1 }
 0x214   : > { %v1024_v19 = vpop.f32.mrf.mxu1 }
 0x216   : > { %v1026_v27 = vpop.f32.mrf.mxu1 }
 0x218   : > { %v1030_v17 = vpop.f32.mrf.mxu1 }
 0x21a   : > { %v1032_v30 = vpop.f32.mrf.mxu1 }
 0x21c   : > { %v1034_v29 = vpop.f32.mrf.mxu1 }
 0x21e   : > { %v1036_v11 = vpop.f32.mrf.mxu1 }
 0x220   : > { %v1040_v15 = vpop.f32.mrf.mxu1 }
 0x221   : > { %v1041_v28 = vadd.f32 %v1040_v15, %v2906_v44 }
 0x222   : > { %v1042_v34 = vpop.f32.mrf.mxu1 }
 0x223   : > { %v1043_v0 = vadd.f32 %v1042_v34, %v2906_v44  ;;  %v1035_v34 = vadd.f32 %v1034_v29, %v2912_v35  ;;  %v1023_v44 = vadd.f32 %v1022_v25, %v2914_v47 }
 0x224   : > { %v1044_v37 = vpop.f32.mrf.mxu1 }
 0x225   : > { %v1045_v31 = vadd.f32 %v1044_v37, %v2908_v46  ;;  %v1090_v13 = vmax.f32 %v1043_v0, 0.0  ;;  %v1082_v25 = vmax.f32 %v1023_v44, 0.0 }
 0x226   : > { %v1046_v22 = vpop.f32.mrf.mxu1 }
 0x227   : > { %v1047_v60 = vadd.f32 %v1046_v22, %v2908_v46  ;;  %v1091_v22 = vmax.f32 %v1045_v31, 0.0  ;;  %v1027_v46 = vadd.f32 %v1026_v27, %v2916_v48  ;;  %v1021_v27 = vadd.f32 %v2938_v10, %v2914_v47 }
 0x228   : > { %v1050_v32 = vpop.f32.mrf.mxu1 }
 0x229   : > { %v1051_v63 = vadd.f32 %v1050_v32, %v2902_v18  ;;  %v1084_v29 = vmax.f32 %v1027_v46, 0.0 }
 0x22a   : > { %v1052_v24 = vpop.f32.mrf.mxu1 }
 0x22b   : > { %v1053_v51 = vadd.f32 %v1052_v24, %v2902_v18  ;;  %v1093_v5 = vmax.f32 %v1051_v63, 0.0  ;;  %v1033_v18 = vadd.f32 %v1032_v30, %v2910_v21  ;;  %v1025_v30 = vadd.f32 %v1024_v19, %v2916_v48 }
 0x22c   : > { %v1054_v26 = vpop.f32.mrf.mxu1  ;;  %v1015_v48 = vadd.f32 %v2934_v8, %v2920_v49  ;;  %v2382_v8 = vld [vmem:[%s3253_s5 + $0x38] sm:$0xff]  }
 0x22d   : > { %v1055_v58 = vadd.f32 %v1054_v26, %v2904_v41  ;;  %v1094_v23 = vmax.f32 %v1053_v51, 0.0  ;;  %v1089_v26 = vmax.f32 %v1041_v28, 0.0  ;;  %v1086_v15 = vmax.f32 %v1033_v18, 0.0 }
 0x22e   : > { %v1056_v16 = vpop.f32.mrf.mxu1  ;;  %v1083_v19 = vmax.f32 %v1025_v30, 0.0  ;;  %v1079_v10 = vmax.f32 %v1015_v48, 0.0 }
 0x22f   : > { %v1057_v42 = vadd.f32 %v1056_v16, %v2904_v41  ;;  %v1095_v1 = vmax.f32 %v1055_v58, 0.0  ;;  %v1092_v41 = vmax.f32 %v1047_v60, 0.0  ;;  %v1087_v16 = vmax.f32 %v1035_v34, 0.0  ;;  %v3007_v58 = vpop.permute.xlu1 %1226 }
 0x230   : > { %v1060_v45 = vpop.f32.mrf.mxu1 }
 0x231   : > { %v1061_v54 = vadd.f32 %v1060_v45, %v2898_v38  ;;  %v1096_v33 = vmax.f32 %v1057_v42, 0.0  ;;  %v1113_v32 = vpack.c.bf16 %v1095_v1, %v1093_v5  ;;  %v1112_v24 = vpack.c.bf16 %v1092_v41, %v1090_v13 }
 0x232   : > { %v1062_v50 = vpop.f32.mrf.mxu1  ;;  %v1111_v45 = vpack.c.bf16 %v1091_v22, %v1089_v26 }
 0x233   : > { %v1063_v52 = vadd.f32 %v1062_v50, %v2898_v38  ;;  %v1097_v55 = vmax.f32 %v1061_v54, 0.0  ;;  %v1114_v3 = vpack.c.bf16 %v1096_v33, %v1094_v23  ;;  %v3011_v60 = vpop.permute.xlu1 %1216 }
 0x234   : > { %v1064_v12 = vpop.f32.mrf.mxu1 }
 0x235   : > { %v1065_v53 = vadd.f32 %v1064_v12, %v2900_v40  ;;  %v1098_v61 = vmax.f32 %v1063_v52, 0.0  ;;  %v1108_v52 = vpack.c.bf16 %v1084_v29, %v1082_v25 }
 0x236   : > { %v1066_v56 = vpop.f32.mrf.mxu1 }
 0x237   : > { %v1067_v57 = vadd.f32 %v1066_v56, %v2900_v40  ;;  %v1099_v59 = vmax.f32 %v1065_v53, 0.0  ;;  %v1037_v40 = vadd.f32 %v1036_v11, %v2912_v35  ;;  %v1031_v11 = vadd.f32 %v1030_v17, %v2910_v21 }
 0x238   : > { %v1017_v35 = vadd.f32 %v2936_v9, %v2920_v49  ;;  %v1013_v21 = vadd.f32 %v2930_v7, %v2918_v14  ;;  %v1011_v9 = vadd.f32 %v2926_v4, %v2918_v14  ;;  %v1081_v53 = vmax.f32 %v1021_v27, 0.0  ;;  %v2375_v14 = vld [vmem:[%s3253_s5] sm:$0xff]   ;;  %v2376_v49 = vld [vmem:[%s3253_s5 + $0x8] sm:$0xff]  }
 0x239   : > { %v1100_v62 = vmax.f32 %v1067_v57, 0.0  ;;  %v1115_v36 = vpack.c.bf16 %v1099_v59, %v1097_v55  ;;  %v1088_v37 = vmax.f32 %v1037_v40, 0.0  ;;  %v1085_v12 = vmax.f32 %v1031_v11, 0.0  ;;  %v2379_v4 = vld [vmem:[%s3253_s5 + $0x20] sm:$0xff]   ;;  %v3005_v57 = vpop.permute.xlu0 %1221 }
 0x23a   : > { %v1080_v42 = vmax.f32 %v1017_v35, 0.0  ;;  %v1078_v47 = vmax.f32 %v1013_v21, 0.0  ;;  %v1107_v54 = vpack.c.bf16 %v1083_v19, %v1081_v53  ;;  %v1077_v7 = vmax.f32 %v1011_v9, 0.0 }
 0x23b   : > { %v1116_v38 = vpack.c.bf16 %v1100_v62, %v1098_v61  ;;  %v1110_v50 = vpack.c.bf16 %v1088_v37, %v1086_v15  ;;  %v1109_v17 = vpack.c.bf16 %v1087_v16, %v1085_v12  ;;  %v3015_v61 = vpop.permute.xlu1 %1206 }
 0x23c   : > { %v1106_v56 = vpack.c.bf16 %v1080_v42, %v1078_v47  ;;  %v1105_v51 = vpack.c.bf16 %v1079_v10, %v1077_v7 }
 0x23d   : > { %1277 = vmatprep.subr.bf16.mxu0 %v1116_v38  ;;  %v3009_v59 = vpop.permute.xlu0 %1211 }
 0x23e   : > { %1278 = vmatpush1.bf16.msra.mxu0 %v1115_v36 }
 0x23f   : > { %1279 = vmatprep.subr.bf16.mxu0 %v1114_v3  ;;  %v3019_v63 = vpop.permute.xlu1 %1196 }
 0x241   : > { %v3013_v33 = vpop.permute.xlu0 %1201 }
 0x242   : > { %1280 = vmatpush1.bf16.msra.mxu0 %v1113_v32 }
 0x243   : > { %1281 = vmatprep.subr.bf16.mxu0 %v1112_v24  ;;  %v3023_v0 = vpop.permute.xlu1 %1186 }
 0x245   : > { %v3017_v62 = vpop.permute.xlu0 %1191 }
 0x246   : > { %1282 = vmatpush1.bf16.msra.mxu0 %v1111_v45 }
 0x247   : > { %1283 = vmatprep.subr.bf16.mxu0 %v1110_v50  ;;  %v3027_v38 = vpop.permute.xlu1 %1176 }
 0x249   : > { %v3021_v55 = vpop.permute.xlu0 %1181 }
 0x24a   : > { %1284 = vmatpush1.bf16.msra.mxu0 %v1109_v17 }
 0x24b   : > { %1285 = vmatprep.subr.bf16.mxu0 %v1108_v52  ;;  %v1167_v1 = vpop.permute.xlu1 %1166 }
 0x24d   : > { %v3025_v23 = vpop.permute.xlu0 %1171 }
 0x24e   : > { %1286 = vmatpush1.bf16.msra.mxu0 %v1107_v54 }
 0x24f   : > { %1287 = vmatprep.subr.bf16.mxu0 %v1106_v56  ;;  %v1157_v28 = vpop.permute.xlu1 %1156 }
 0x251   : > { %v1162_v31 = vpop.permute.xlu0 %1161 }
 0x252   : > { %1288 = vmatpush1.bf16.msra.mxu0 %v1105_v51 }
 0x253   : > { %1289 = vmatprep.subr.bf16.mxu0 %v2932_v20  ;;  %v2381_v20 = vld [vmem:[%s3253_s5 + $0x30] sm:$0xff]  }
 0x255   : > { %v1152_v40 = vpop.permute.xlu0 %1151 }
 0x256   : > { %1290 = vmatpush1.bf16.msra.mxu0 %v2928_v6  ;;  %v2380_v6 = vld [vmem:[%s3253_s5 + $0x28] sm:$0xff]  }
 0x257   : > { %1291 = vmatprep.subr.bf16.mxu0 %v2924_v43  ;;  %v2377_v43 = vld [vmem:[%s3253_s5 + $0x10] sm:$0xff]  }
 0x25a   : > { %1292 = vmatpush1.bf16.msra.mxu0 %v2922_v39  ;;  %v2378_v39 = vld [vmem:[%s3253_s5 + $0x18] sm:$0xff]  }
 0x25d   : > { %1310 = vmatmul.mubr.bf16.vlgmr.msra.gmra.mxu0 %v2375_v14 }
 0x25e   : > { %1319 = vmatprep.mubr.bf16.mxu0 %v2423_v2 }
 0x265   : > { %1320 = vmatmul.mubr.bf16.gmra.mxu0 %v2376_v49 }
 0x266   : > { %1329 = vmatprep.mubr.bf16.mxu0 %v2423_v2 }
 0x26d   : > { %1330 = vmatmul.mubr.bf16.gmra.mxu0 %v2377_v43 }
 0x26e   : > { %1339 = vmatprep.mubr.bf16.mxu0 %v2423_v2 }
 0x275   : > { %1340 = vmatmul.mubr.bf16.gmra.mxu0 %v2378_v39 }
 0x276   : > { %1349 = vmatprep.mubr.bf16.mxu0 %v2423_v2 }
 0x27d   : > { %1350 = vmatmul.mubr.bf16.gmra.mxu0 %v2379_v4 }
 0x27e   : > { %1359 = vmatprep.mubr.bf16.mxu0 %v2423_v2 }
 0x285   : > { %1360 = vmatmul.mubr.bf16.gmra.mxu0 %v2380_v6 }
 0x286   : > { %1369 = vmatprep.mubr.bf16.mxu0 %v2423_v2 }
 0x28d   : > { %1370 = vmatmul.mubr.bf16.gmra.mxu0 %v2381_v20 }
 0x28e   : > { %1379 = vmatprep.mubr.bf16.mxu0 %v2423_v2 }
 0x295   : > { %1380 = vmatmul.mubr.bf16.gmra.mxu0 %v2382_v8 }
 0x296   : > { %1951 = vmatprep.mubr.bf16.mxu0 %v2423_v2 }
 0x31d   : > { %v1311_v36 = vpop.f32.mrf.mxu0 }
 0x31e   : > { %v1312_v3 = vadd.f32 %v1311_v36, %v1152_v40 }
 0x31f   : > { %v1313_v41 = vpop.f32.mrf.mxu0 }
 0x320   : > { %v1314_v18 = vadd.f32 %v1313_v41, %v1152_v40  ;;  %v1390_v22 = vmax.f32 %v1312_v3, 0.0 }
 0x321   : > { %v1315_v5 = vpop.f32.mrf.mxu0 }
 0x322   : > { %v1316_v13 = vadd.f32 %v1315_v5, %v1157_v28  ;;  %v1391_v24 = vmax.f32 %v1314_v18, 0.0 }
 0x323   : > { %v1317_v34 = vpop.f32.mrf.mxu0 }
 0x324   : > { %v1392_v32 = vmax.f32 %v1316_v13, 0.0  ;;  %v1318_v46 = vadd.f32 %v1317_v34, %v1157_v28 }
 0x325   : > { %v1321_v37 = vpop.f32.mrf.mxu0 }
 0x326   : > { %v3029_v11 = vpack.c.bf16 %v1392_v32, %v1390_v22  ;;  %v1393_v26 = vmax.f32 %v1318_v46, 0.0  ;;  %v1322_v30 = vadd.f32 %v1321_v37, %v1162_v31 }
 0x327   : > { %v1323_v44 = vpop.f32.mrf.mxu0 }
 0x328   : > { %v3031_v15 = vpack.c.bf16 %v1393_v26, %v1391_v24  ;;  %v1324_v45 = vadd.f32 %v1323_v44, %v1162_v31  ;;  %v1394_v50 = vmax.f32 %v1322_v30, 0.0 }
 0x329   : > { %v1325_v16 = vpop.f32.mrf.mxu0 }
 0x32a   : > { %v1326_v35 = vadd.f32 %v1325_v16, %v1167_v1  ;;  %v1395_v25 = vmax.f32 %v1324_v45, 0.0 }
 0x32b   : > { %v1327_v29 = vpop.f32.mrf.mxu0 }
 0x32c   : > { %v1396_v27 = vmax.f32 %v1326_v35, 0.0  ;;  %v1328_v12 = vadd.f32 %v1327_v29, %v1167_v1 }
 0x32d   : > { %v3033_v21 = vpop.f32.mrf.mxu0 }
 0x32e   : > { %v3035_v48 = vpack.c.bf16 %v1396_v27, %v1394_v50  ;;  %v1397_v19 = vmax.f32 %v1328_v12, 0.0 }
 0x32f   : > { %v3037_v17 = vpop.f32.mrf.mxu0 }
 0x330   : > { %v3039_v42 = vpack.c.bf16 %v1397_v19, %v1395_v25 }
 0x331   : > { %v3041_v52 = vpop.f32.mrf.mxu0 }
 0x333   : > { %v3043_v9 = vpop.f32.mrf.mxu0 }
 0x335   : > { %v3045_v53 = vpop.f32.mrf.mxu0 }
 0x337   : > { %v1343_v47 = vpop.f32.mrf.mxu0 }
 0x339   : > { %v1345_v10 = vpop.f32.mrf.mxu0 }
 0x33b   : > { %v1347_v54 = vpop.f32.mrf.mxu0 }
 0x33d   : > { %v1351_v56 = vpop.f32.mrf.mxu0 }
 0x33f   : > { %v1353_v7 = vpop.f32.mrf.mxu0 }
 0x341   : > { %v1355_v51 = vpop.f32.mrf.mxu0 }
 0x343   : > { %v1357_v14 = vpop.f32.mrf.mxu0 }
 0x345   : > { %v1361_v49 = vpop.f32.mrf.mxu0 }
 0x346   : > { %v1362_v12 = vadd.f32 %v1361_v49, %v3013_v33 }
 0x347   : > { %v1363_v43 = vpop.f32.mrf.mxu0 }
 0x348   : > { %v1364_v16 = vadd.f32 %v1363_v43, %v3013_v33  ;;  %v1356_v43 = vadd.f32 %v1355_v51, %v3019_v63  ;;  %v1344_v33 = vadd.f32 %v1343_v47, %v3021_v55 }
 0x349   : > { %v1365_v39 = vpop.f32.mrf.mxu0 }
 0x34a   : > { %v1366_v35 = vadd.f32 %v1365_v39, %v3015_v61  ;;  %v1411_v19 = vmax.f32 %v1364_v16, 0.0  ;;  %v1403_v47 = vmax.f32 %v1344_v33, 0.0 }
 0x34b   : > { %v1367_v4 = vpop.f32.mrf.mxu0 }
 0x34c   : > { %v1368_v46 = vadd.f32 %v1367_v4, %v3015_v61  ;;  %v1412_v4 = vmax.f32 %v1366_v35, 0.0  ;;  %v1348_v61 = vadd.f32 %v1347_v54, %v3023_v0  ;;  %v1342_v54 = vadd.f32 %v3045_v53, %v3021_v55 }
 0x34d   : > { %v1371_v6 = vpop.f32.mrf.mxu0 }
 0x34e   : > { %v1372_v44 = vadd.f32 %v1371_v6, %v3009_v59  ;;  %v1405_v51 = vmax.f32 %v1348_v61, 0.0 }
 0x34f   : > { %v1373_v20 = vpop.f32.mrf.mxu0 }
 0x350   : > { %v1374_v13 = vadd.f32 %v1373_v20, %v3009_v59  ;;  %v1414_v25 = vmax.f32 %v1372_v44, 0.0  ;;  %v1354_v59 = vadd.f32 %v1353_v7, %v3017_v62  ;;  %v1346_v7 = vadd.f32 %v1345_v10, %v3023_v0 }
 0x351   : > { %v1375_v8 = vpop.f32.mrf.mxu0  ;;  %v1336_v0 = vadd.f32 %v3041_v52, %v3027_v38  ;;  %v2390_v52 = vld [vmem:[%s3255_s7 + $0x38] sm:$0xff]  }
 0x352   : > { %v1376_v22 = vadd.f32 %v1375_v8, %v3011_v60  ;;  %v1415_v45 = vmax.f32 %v1374_v13, 0.0  ;;  %v1410_v8 = vmax.f32 %v1362_v12, 0.0  ;;  %v1407_v49 = vmax.f32 %v1354_v59, 0.0 }
 0x353   : > { %v1377_v31 = vpop.f32.mrf.mxu0  ;;  %v1404_v10 = vmax.f32 %v1346_v7, 0.0  ;;  %v1400_v53 = vmax.f32 %v1336_v0, 0.0 }
 0x354   : > { %v1378_v41 = vadd.f32 %v1377_v31, %v3011_v60  ;;  %v1416_v29 = vmax.f32 %v1376_v22, 0.0  ;;  %v1413_v60 = vmax.f32 %v1368_v46, 0.0  ;;  %v1408_v31 = vmax.f32 %v1356_v43, 0.0  ;;  %v3113_v22 = vpop.permute.xlu1 %1547 }
 0x355   : > { %v1381_v1 = vpop.f32.mrf.mxu0 }
 0x356   : > { %v1382_v5 = vadd.f32 %v1381_v1, %v3005_v57  ;;  %v1417_v37 = vmax.f32 %v1378_v41, 0.0  ;;  %v1434_v6 = vpack.c.bf16 %v1416_v29, %v1414_v25  ;;  %v1433_v20 = vpack.c.bf16 %v1413_v60, %v1411_v19 }
 0x357   : > { %v1383_v36 = vpop.f32.mrf.mxu0  ;;  %v1432_v1 = vpack.c.bf16 %v1412_v4, %v1410_v8 }
 0x358   : > { %v1384_v3 = vadd.f32 %v1383_v36, %v3005_v57  ;;  %v1418_v30 = vmax.f32 %v1382_v5, 0.0  ;;  %v1435_v27 = vpack.c.bf16 %v1417_v37, %v1415_v45  ;;  %v3117_v46 = vpop.permute.xlu1 %1537 }
 0x359   : > { %v1385_v40 = vpop.f32.mrf.mxu0 }
 0x35a   : > { %v1386_v28 = vadd.f32 %v1385_v40, %v3007_v58  ;;  %v1419_v24 = vmax.f32 %v1384_v3, 0.0  ;;  %v1429_v3 = vpack.c.bf16 %v1405_v51, %v1403_v47 }
 0x35b   : > { %v1387_v18 = vpop.f32.mrf.mxu0 }
 0x35c   : > { %v1388_v34 = vadd.f32 %v1387_v18, %v3007_v58  ;;  %v1420_v32 = vmax.f32 %v1386_v28, 0.0  ;;  %v1358_v58 = vadd.f32 %v1357_v14, %v3019_v63  ;;  %v1352_v14 = vadd.f32 %v1351_v56, %v3017_v62 }
 0x35d   : > { %v1338_v63 = vadd.f32 %v3043_v9, %v3027_v38  ;;  %v1334_v62 = vadd.f32 %v3037_v17, %v3025_v23  ;;  %v1332_v9 = vadd.f32 %v3033_v21, %v3025_v23  ;;  %v1402_v28 = vmax.f32 %v1342_v54, 0.0  ;;  %v2383_v23 = vld [vmem:[%s3255_s7] sm:$0xff]   ;;  %v2384_v38 = vld [vmem:[%s3255_s7 + $0x8] sm:$0xff]  }
 0x35e   : > { %v1421_v26 = vmax.f32 %v1388_v34, 0.0  ;;  %v1436_v50 = vpack.c.bf16 %v1420_v32, %v1418_v30  ;;  %v1409_v39 = vmax.f32 %v1358_v58, 0.0  ;;  %v1406_v40 = vmax.f32 %v1352_v14, 0.0  ;;  %v2387_v21 = vld [vmem:[%s3255_s7 + $0x20] sm:$0xff]   ;;  %v3111_v34 = vpop.permute.xlu0 %1542 }
 0x35f   : > { %v1401_v41 = vmax.f32 %v1338_v63, 0.0  ;;  %v1399_v55 = vmax.f32 %v1334_v62, 0.0  ;;  %v1428_v5 = vpack.c.bf16 %v1404_v10, %v1402_v28  ;;  %v1398_v17 = vmax.f32 %v1332_v9, 0.0 }
 0x360   : > { %v1437_v57 = vpack.c.bf16 %v1421_v26, %v1419_v24  ;;  %v1431_v36 = vpack.c.bf16 %v1409_v39, %v1407_v49  ;;  %v1430_v56 = vpack.c.bf16 %v1408_v31, %v1406_v40  ;;  %v3121_v24 = vpop.permute.xlu1 %1527 }
 0x361   : > { %v1427_v18 = vpack.c.bf16 %v1401_v41, %v1399_v55  ;;  %v1426_v13 = vpack.c.bf16 %v1400_v53, %v1398_v17 }
 0x362   : > { %1598 = vmatprep.subr.bf16.mxu1 %v1437_v57  ;;  %v3115_v32 = vpop.permute.xlu0 %1532 }
 0x363   : > { %1599 = vmatpush1.bf16.msra.mxu1 %v1436_v50 }
 0x364   : > { %1600 = vmatprep.subr.bf16.mxu1 %v1435_v27  ;;  %v3125_v44 = vpop.permute.xlu1 %1517 }
 0x366   : > { %v3119_v37 = vpop.permute.xlu0 %1522 }
 0x367   : > { %1601 = vmatpush1.bf16.msra.mxu1 %v1434_v6 }
 0x368   : > { %1602 = vmatprep.subr.bf16.mxu1 %v1433_v20  ;;  %v3129_v16 = vpop.permute.xlu1 %1507 }
 0x36a   : > { %v3123_v26 = vpop.permute.xlu0 %1512 }
 0x36b   : > { %1603 = vmatpush1.bf16.msra.mxu1 %v1432_v1 }
 0x36c   : > { %1604 = vmatprep.subr.bf16.mxu1 %v1431_v36  ;;  %v3133_v57 = vpop.permute.xlu1 %1497 }
 0x36e   : > { %v3127_v30 = vpop.permute.xlu0 %1502 }
 0x36f   : > { %1605 = vmatpush1.bf16.msra.mxu1 %v1430_v56 }
 0x370   : > { %1606 = vmatprep.subr.bf16.mxu1 %v1429_v3  ;;  %v1488_v29 = vpop.permute.xlu1 %1487 }
 0x372   : > { %v3131_v45 = vpop.permute.xlu0 %1492 }
 0x373   : > { %1607 = vmatpush1.bf16.msra.mxu1 %v1428_v5 }
 0x374   : > { %1608 = vmatprep.subr.bf16.mxu1 %v1427_v18  ;;  %v1478_v12 = vpop.permute.xlu1 %1477 }
 0x376   : > { %v1483_v35 = vpop.permute.xlu0 %1482 }
 0x377   : > { %1609 = vmatpush1.bf16.msra.mxu1 %v1426_v13 }
 0x378   : > { %1610 = vmatprep.subr.bf16.mxu1 %v3039_v42  ;;  %v2389_v42 = vld [vmem:[%s3255_s7 + $0x30] sm:$0xff]  }
 0x37a   : > { %v1473_v58 = vpop.permute.xlu0 %1472 }
 0x37b   : > { %1611 = vmatpush1.bf16.msra.mxu1 %v3035_v48  ;;  %v2388_v48 = vld [vmem:[%s3255_s7 + $0x28] sm:$0xff]  }
 0x37c   : > { %1612 = vmatprep.subr.bf16.mxu1 %v3031_v15  ;;  %v2385_v15 = vld [vmem:[%s3255_s7 + $0x10] sm:$0xff]  }
 0x37f   : > { %1613 = vmatpush1.bf16.msra.mxu1 %v3029_v11  ;;  %v2386_v11 = vld [vmem:[%s3255_s7 + $0x18] sm:$0xff]  }
 0x382   : > { %1631 = vmatmul.mubr.bf16.vlgmr.msra.gmra.mxu1 %v2383_v23 }
 0x383   : > { %1640 = vmatprep.mubr.bf16.mxu1 %v2423_v2 }
 0x38a   : > { %1641 = vmatmul.mubr.bf16.gmra.mxu1 %v2384_v38 }
 0x38b   : > { %1650 = vmatprep.mubr.bf16.mxu1 %v2423_v2 }
 0x392   : > { %1651 = vmatmul.mubr.bf16.gmra.mxu1 %v2385_v15 }
 0x393   : > { %1660 = vmatprep.mubr.bf16.mxu1 %v2423_v2 }
 0x39a   : > { %1661 = vmatmul.mubr.bf16.gmra.mxu1 %v2386_v11 }
 0x39b   : > { %1670 = vmatprep.mubr.bf16.mxu1 %v2423_v2 }
 0x3a2   : > { %1671 = vmatmul.mubr.bf16.gmra.mxu1 %v2387_v21 }
 0x3a3   : > { %1680 = vmatprep.mubr.bf16.mxu1 %v2423_v2 }
 0x3aa   : > { %1681 = vmatmul.mubr.bf16.gmra.mxu1 %v2388_v48 }
 0x3ab   : > { %1690 = vmatprep.mubr.bf16.mxu1 %v2423_v2 }
 0x3b2   : > { %1691 = vmatmul.mubr.bf16.gmra.mxu1 %v2389_v42 }
 0x3b3   : > { %1700 = vmatprep.mubr.bf16.mxu1 %v2423_v2 }
 0x3ba   : > { %1701 = vmatmul.mubr.bf16.gmra.mxu1 %v2390_v52 }
 0x442   : > { %v1632_v50 = vpop.f32.mrf.mxu1 }
 0x443   : > { %v1633_v27 = vadd.f32 %v1632_v50, %v1473_v58 }
 0x444   : > { %v1634_v60 = vpop.f32.mrf.mxu1 }
 0x445   : > { %v1635_v59 = vadd.f32 %v1634_v60, %v1473_v58  ;;  %v1711_v4 = vmax.f32 %v1633_v27, 0.0 }
 0x446   : > { %v1636_v25 = vpop.f32.mrf.mxu1 }
 0x447   : > { %v1637_v19 = vadd.f32 %v1636_v25, %v1478_v12  ;;  %v1712_v20 = vmax.f32 %v1635_v59, 0.0 }
 0x448   : > { %v1638_v43 = vpop.f32.mrf.mxu1 }
 0x449   : > { %v1713_v6 = vmax.f32 %v1637_v19, 0.0  ;;  %v1639_v61 = vadd.f32 %v1638_v43, %v1478_v12 }
 0x44a   : > { %v1642_v39 = vpop.f32.mrf.mxu1 }
 0x44b   : > { %v3135_v14 = vpack.c.bf16 %v1713_v6, %v1711_v4  ;;  %v1714_v8 = vmax.f32 %v1639_v61, 0.0  ;;  %v1643_v7 = vadd.f32 %v1642_v39, %v1483_v35 }
 0x44c   : > { %v1644_v33 = vpop.f32.mrf.mxu1 }
 0x44d   : > { %v3137_v49 = vpack.c.bf16 %v1714_v8, %v1712_v20  ;;  %v1645_v1 = vadd.f32 %v1644_v33, %v1483_v35  ;;  %v1715_v36 = vmax.f32 %v1643_v7, 0.0 }
 0x44e   : > { %v1646_v31 = vpop.f32.mrf.mxu1 }
 0x44f   : > { %v1647_v63 = vadd.f32 %v1646_v31, %v1488_v29  ;;  %v1716_v47 = vmax.f32 %v1645_v1, 0.0 }
 0x450   : > { %v1648_v51 = vpop.f32.mrf.mxu1 }
 0x451   : > { %v1717_v54 = vmax.f32 %v1647_v63, 0.0  ;;  %v1649_v40 = vadd.f32 %v1648_v51, %v1488_v29 }
 0x452   : > { %v3139_v62 = vpop.f32.mrf.mxu1 }
 0x453   : > { %v3141_v0 = vpack.c.bf16 %v1717_v54, %v1715_v36  ;;  %v1718_v10 = vmax.f32 %v1649_v40, 0.0 }
 0x454   : > { %v3143_v56 = vpop.f32.mrf.mxu1 }
 0x455   : > { %v3145_v41 = vpack.c.bf16 %v1718_v10, %v1716_v47 }
 0x456   : > { %v3147_v3 = vpop.f32.mrf.mxu1 }
 0x458   : > { %v3149_v9 = vpop.f32.mrf.mxu1 }
 0x45a   : > { %v3151_v28 = vpop.f32.mrf.mxu1 }
 0x45c   : > { %v1664_v55 = vpop.f32.mrf.mxu1 }
 0x45e   : > { %v1666_v53 = vpop.f32.mrf.mxu1 }
 0x460   : > { %v1668_v5 = vpop.f32.mrf.mxu1 }
 0x462   : > { %v1672_v18 = vpop.f32.mrf.mxu1 }
 0x464   : > { %v1674_v17 = vpop.f32.mrf.mxu1 }
 0x466   : > { %v1676_v13 = vpop.f32.mrf.mxu1 }
 0x468   : > { %v1678_v23 = vpop.f32.mrf.mxu1 }
 0x46a   : > { %v1682_v38 = vpop.f32.mrf.mxu1 }
 0x46b   : > { %v1683_v40 = vadd.f32 %v1682_v38, %v3119_v37 }
 0x46c   : > { %v1684_v15 = vpop.f32.mrf.mxu1 }
 0x46d   : > { %v1685_v31 = vadd.f32 %v1684_v15, %v3119_v37  ;;  %v1677_v15 = vadd.f32 %v1676_v13, %v3125_v44  ;;  %v1665_v37 = vadd.f32 %v1664_v55, %v3127_v30 }
 0x46e   : > { %v1686_v11 = vpop.f32.mrf.mxu1 }
 0x46f   : > { %v1687_v63 = vadd.f32 %v1686_v11, %v3121_v24  ;;  %v1732_v10 = vmax.f32 %v1685_v31, 0.0  ;;  %v1724_v55 = vmax.f32 %v1665_v37, 0.0 }
 0x470   : > { %v1688_v21 = vpop.f32.mrf.mxu1 }
 0x471   : > { %v1689_v61 = vadd.f32 %v1688_v21, %v3121_v24  ;;  %v1733_v21 = vmax.f32 %v1687_v63, 0.0  ;;  %v1669_v24 = vadd.f32 %v1668_v5, %v3129_v16  ;;  %v1663_v5 = vadd.f32 %v3151_v28, %v3127_v30 }
 0x472   : > { %v1692_v48 = vpop.f32.mrf.mxu1 }
 0x473   : > { %v1693_v33 = vadd.f32 %v1692_v48, %v3115_v32  ;;  %v1726_v13 = vmax.f32 %v1669_v24, 0.0 }
 0x474   : > { %v1694_v42 = vpop.f32.mrf.mxu1 }
 0x475   : > { %v1695_v19 = vadd.f32 %v1694_v42, %v3115_v32  ;;  %v1735_v47 = vmax.f32 %v1693_v33, 0.0  ;;  %v1675_v32 = vadd.f32 %v1674_v17, %v3123_v26  ;;  %v1667_v17 = vadd.f32 %v1666_v53, %v3129_v16 }
 0x476   : > { %v1696_v52 = vpop.f32.mrf.mxu1  ;;  %v1657_v16 = vadd.f32 %v3147_v3, %v3133_v57  ;;  %v2398_v3 = vld [vmem:[%s3257_s9 + $0x38] sm:$0xff]  }
 0x477   : > { %v1697_v4 = vadd.f32 %v1696_v52, %v3117_v46  ;;  %v1736_v1 = vmax.f32 %v1695_v19, 0.0  ;;  %v1731_v52 = vmax.f32 %v1683_v40, 0.0  ;;  %v1728_v38 = vmax.f32 %v1675_v32, 0.0 }
 0x478   : > { %v1698_v35 = vpop.f32.mrf.mxu1  ;;  %v1725_v53 = vmax.f32 %v1667_v17, 0.0  ;;  %v1721_v28 = vmax.f32 %v1657_v16, 0.0 }
 0x479   : > { %v1699_v60 = vadd.f32 %v1698_v35, %v3117_v46  ;;  %v1737_v51 = vmax.f32 %v1697_v4, 0.0  ;;  %v1734_v46 = vmax.f32 %v1689_v61, 0.0  ;;  %v1729_v35 = vmax.f32 %v1677_v15, 0.0  ;;  %v1794_v4 = vpop.permute.xlu0 %1793 }
 0x47a   : > { %v1702_v29 = vpop.f32.mrf.mxu1 }
 0x47b   : > { %v1703_v25 = vadd.f32 %v1702_v29, %v3111_v34  ;;  %v1738_v39 = vmax.f32 %v1699_v60, 0.0  ;;  %v1755_v48 = vpack.c.bf16 %v1737_v51, %v1735_v47  ;;  %v1754_v42 = vpack.c.bf16 %v1734_v46, %v1732_v10 }
 0x47c   : > { %v1704_v50 = vpop.f32.mrf.mxu1  ;;  %v1753_v29 = vpack.c.bf16 %v1733_v21, %v1731_v52 }
 0x47d   : > { %v1705_v27 = vadd.f32 %v1704_v50, %v3111_v34  ;;  %v1739_v7 = vmax.f32 %v1703_v25, 0.0  ;;  %v1756_v54 = vpack.c.bf16 %v1738_v39, %v1736_v1  ;;  %v1804_v63 = vpop.permute.xlu0 %1803 }
 0x47e   : > { %v1706_v58 = vpop.f32.mrf.mxu1 }
 0x47f   : > { %v1707_v12 = vadd.f32 %v1706_v58, %v3113_v22  ;;  %v1740_v20 = vmax.f32 %v1705_v27, 0.0  ;;  %v1750_v27 = vpack.c.bf16 %v1726_v13, %v1724_v55 }
 0x480   : > { %v1708_v59 = vpop.f32.mrf.mxu1 }
 0x481   : > { %v1709_v43 = vadd.f32 %v1708_v59, %v3113_v22  ;;  %v1741_v6 = vmax.f32 %v1707_v12, 0.0  ;;  %v1679_v22 = vadd.f32 %v1678_v23, %v3125_v44  ;;  %v1673_v23 = vadd.f32 %v1672_v18, %v3123_v26 }
 0x482   : > { %v1659_v44 = vadd.f32 %v3149_v9, %v3133_v57  ;;  %v1655_v26 = vadd.f32 %v3143_v56, %v3131_v45  ;;  %v1653_v9 = vadd.f32 %v3139_v62, %v3131_v45  ;;  %v1723_v12 = vmax.f32 %v1663_v5, 0.0  ;;  %v2391_v45 = vld [vmem:[%s3257_s9] sm:$0xff]   ;;  %v2392_v57 = vld [vmem:[%s3257_s9 + $0x8] sm:$0xff]  }
 0x483   : > { %v1742_v8 = vmax.f32 %v1709_v43, 0.0  ;;  %v1757_v36 = vpack.c.bf16 %v1741_v6, %v1739_v7  ;;  %v1730_v11 = vmax.f32 %v1679_v22, 0.0  ;;  %v1727_v58 = vmax.f32 %v1673_v23, 0.0  ;;  %v2395_v62 = vld [vmem:[%s3257_s9 + $0x20] sm:$0xff]  }
 0x484   : > { %v1722_v60 = vmax.f32 %v1659_v44, 0.0  ;;  %v1720_v30 = vmax.f32 %v1655_v26, 0.0  ;;  %v1749_v25 = vpack.c.bf16 %v1725_v53, %v1723_v12  ;;  %v1719_v56 = vmax.f32 %v1653_v9, 0.0 }
 0x485   : > { %v1758_v34 = vpack.c.bf16 %v1742_v8, %v1740_v20  ;;  %v1752_v50 = vpack.c.bf16 %v1730_v11, %v1728_v38  ;;  %v1751_v18 = vpack.c.bf16 %v1729_v35, %v1727_v58  ;;  %v1799_v8 = vpop.permute.xlu1 %1798 }
 0x486   : > { %v1748_v59 = vpack.c.bf16 %v1722_v60, %v1720_v30  ;;  %v1747_v19 = vpack.c.bf16 %v1721_v28, %v1719_v56 }
 0x487   : > { %1919 = vmatprep.subr.bf16.mxu0 %v1758_v34 }
 0x488   : > { %1920 = vmatpush1.bf16.msra.mxu0 %v1757_v36 }
 0x489   : > { %1921 = vmatprep.subr.bf16.mxu0 %v1756_v54  ;;  %v1809_v40 = vpop.permute.xlu1 %1808 }
 0x48c   : > { %1922 = vmatpush1.bf16.msra.mxu0 %v1755_v48  ;;  %v1814_v48 = vpop.permute.xlu0 %1813 }
 0x48d   : > { %1923 = vmatprep.subr.bf16.mxu0 %v1754_v42  ;;  %v1819_v37 = vpop.permute.xlu1 %1818 }
 0x490   : > { %1924 = vmatpush1.bf16.msra.mxu0 %v1753_v29  ;;  %v1824_v13 = vpop.permute.xlu0 %1823 }
 0x491   : > { %1925 = vmatprep.subr.bf16.mxu0 %v1752_v50  ;;  %v1829_v16 = vpop.permute.xlu1 %1828 }
 0x494   : > { %1926 = vmatpush1.bf16.msra.mxu0 %v1751_v18  ;;  %v1834_v12 = vpop.permute.xlu0 %1833 }
 0x495   : > { %1927 = vmatprep.subr.bf16.mxu0 %v1750_v27 }
 0x498   : > { %1928 = vmatpush1.bf16.msra.mxu0 %v1749_v25 }
 0x499   : > { %1929 = vmatprep.subr.bf16.mxu0 %v1748_v59 }
 0x49c   : > { %1930 = vmatpush1.bf16.msra.mxu0 %v1747_v19  ;;  %v1839_v19 = vpop.permute.xlu1 %1838 }
 0x49d   : > { %1931 = vmatprep.subr.bf16.mxu0 %v3145_v41  ;;  %v2397_v41 = vld [vmem:[%s3257_s9 + $0x30] sm:$0xff]  }
 0x4a0   : > { %1932 = vmatpush1.bf16.msra.mxu0 %v3141_v0  ;;  %v2396_v0 = vld [vmem:[%s3257_s9 + $0x28] sm:$0xff]  }
 0x4a1   : > { %1933 = vmatprep.subr.bf16.mxu0 %v3137_v49  ;;  %v2393_v49 = vld [vmem:[%s3257_s9 + $0x10] sm:$0xff]  }
 0x4a4   : > { %1934 = vmatpush1.bf16.msra.mxu0 %v3135_v14  ;;  %v2394_v14 = vld [vmem:[%s3257_s9 + $0x18] sm:$0xff]  }
 0x4a7   : > { %1952 = vmatmul.mubr.bf16.vlgmr.msra.gmra.mxu0 %v2391_v45 }
 0x4a8   : > { %1961 = vmatprep.mubr.bf16.mxu0 %v2423_v2 }
 0x4af   : > { %1962 = vmatmul.mubr.bf16.gmra.mxu0 %v2392_v57 }
 0x4b0   : > { %1971 = vmatprep.mubr.bf16.mxu0 %v2423_v2 }
 0x4b7   : > { %1972 = vmatmul.mubr.bf16.gmra.mxu0 %v2393_v49 }
 0x4b8   : > { %1981 = vmatprep.mubr.bf16.mxu0 %v2423_v2 }
 0x4bf   : > { %1982 = vmatmul.mubr.bf16.gmra.mxu0 %v2394_v14 }
 0x4c0   : > { %1991 = vmatprep.mubr.bf16.mxu0 %v2423_v2 }
 0x4c7   : > { %1992 = vmatmul.mubr.bf16.gmra.mxu0 %v2395_v62 }
 0x4c8   : > { %2001 = vmatprep.mubr.bf16.mxu0 %v2423_v2 }
 0x4cf   : > { %2002 = vmatmul.mubr.bf16.gmra.mxu0 %v2396_v0  ;;  %v1844_v0 = vpop.permute.xlu0 %1843 }
 0x4d0   : > { %2011 = vmatprep.mubr.bf16.mxu0 %v2423_v2 }
 0x4d7   : > { %2012 = vmatmul.mubr.bf16.gmra.mxu0 %v2397_v41 }
 0x4d8   : > { %2021 = vmatprep.mubr.bf16.mxu0 %v2423_v2 }
 0x4df   : > { %2022 = vmatmul.mubr.bf16.gmra.mxu0 %v2398_v3 }
 0x567   : > { %v1953_v43 = vpop.f32.mrf.mxu0 }
 0x568   : > { %v1954_v61 = vadd.f32 %v1953_v43, %v1794_v4 }
 0x569   : > { %v1955_v6 = vpop.f32.mrf.mxu0 }
 0x56a   : > { %v1956_v39 = vadd.f32 %v1955_v6, %v1794_v4 }
 0x56b   : > { %v1957_v20 = vpop.f32.mrf.mxu0 }
 0x56c   : > { %v2300_v2 = vpack.c.bf16 %v1956_v39, %v1954_v61  ;;  %v1958_v7 = vadd.f32 %v1957_v20, %v1799_v8  ;;  %v1849_v61 = vpop.permute.xlu1 %1848 }
 0x56d   : > { %v1959_v33 = vpop.f32.mrf.mxu0 }
 0x56e   : > { %2128 = vst [vmem:[%s3221_s29] sm:$0xff] %v2300_v2  ;;  %v1960_v31 = vadd.f32 %v1959_v33, %v1799_v8 }
 0x56f   : > { %v1963_v1 = vpop.f32.mrf.mxu0 }
 0x570   : > { %v2301_v34 = vpack.c.bf16 %v1960_v31, %v1958_v7  ;;  %v1964_v36 = vadd.f32 %v1963_v1, %v1804_v63  ;;  %v1854_v7 = vpop.permute.xlu0 %1853 }
 0x571   : > { %v1965_v51 = vpop.f32.mrf.mxu0 }
 0x572   : > { %2129 = vst [vmem:[%s3221_s29 + $0x8] sm:$0xff] %v2301_v34  ;;  %v1966_v22 = vadd.f32 %v1965_v51, %v1804_v63 }
 0x573   : > { %v1967_v46 = vpop.f32.mrf.mxu0 }
 0x574   : > { %v2302_v54 = vpack.c.bf16 %v1966_v22, %v1964_v36  ;;  %v1968_v32 = vadd.f32 %v1967_v46, %v1809_v40  ;;  %v1859_v36 = vpop.permute.xlu1 %1858 }
 0x575   : > { %v1969_v47 = vpop.f32.mrf.mxu0 }
 0x576   : > { %2130 = vst [vmem:[%s3221_s29 + $0x10] sm:$0xff] %v2302_v54  ;;  %v1970_v10 = vadd.f32 %v1969_v47, %v1809_v40 }
 0x577   : > { %v1973_v15 = vpop.f32.mrf.mxu0 }
 0x578   : > { %v2303_v21 = vpack.c.bf16 %v1970_v10, %v1968_v32  ;;  %v1974_v11 = vadd.f32 %v1973_v15, %v1814_v48  ;;  %v1864_v32 = vpop.permute.xlu0 %1863 }
 0x579   : > { %v1975_v24 = vpop.f32.mrf.mxu0 }
 0x57a   : > { %2131 = vst [vmem:[%s3221_s29 + $0x18] sm:$0xff] %v2303_v21  ;;  %v1976_v42 = vadd.f32 %v1975_v24, %v1814_v48 }
 0x57b   : > { %v1977_v23 = vpop.f32.mrf.mxu0 }
 0x57c   : > { %v2304_v52 = vpack.c.bf16 %v1976_v42, %v1974_v11  ;;  %v1978_v17 = vadd.f32 %v1977_v23, %v1819_v37  ;;  %v1869_v11 = vpop.permute.xlu1 %1868 }
 0x57d   : > { %v1979_v38 = vpop.f32.mrf.mxu0 }
 0x57e   : > { %2132 = vst [vmem:[%s3221_s29 + $0x20] sm:$0xff] %v2304_v52  ;;  %v1980_v35 = vadd.f32 %v1979_v38, %v1819_v37 }
 0x57f   : > { %v1983_v29 = vpop.f32.mrf.mxu0 }
 0x580   : > { %v2305_v44 = vpack.c.bf16 %v1980_v35, %v1978_v17  ;;  %v1984_v5 = vadd.f32 %v1983_v29, %v1824_v13 }
 0x581   : > { %v1985_v50 = vpop.f32.mrf.mxu0 }
 0x582   : > { %2133 = vst [vmem:[%s3221_s29 + $0x28] sm:$0xff] %v2305_v44  ;;  %v1986_v58 = vadd.f32 %v1985_v50, %v1824_v13 }
 0x583   : > { %v1987_v26 = vpop.f32.mrf.mxu0 }
 0x584   : > { %v2306_v55 = vpack.c.bf16 %v1986_v58, %v1984_v5  ;;  %v1988_v18 = vadd.f32 %v1987_v26, %v1829_v16 }
 0x585   : > { %v1989_v53 = vpop.f32.mrf.mxu0 }
 0x586   : > { %2134 = vst [vmem:[%s3221_s29 + $0x30] sm:$0xff] %v2306_v55  ;;  %v1990_v60 = vadd.f32 %v1989_v53, %v1829_v16 }
 0x587   : > { %v1993_v27 = vpop.f32.mrf.mxu0 }
 0x588   : > { %v2307_v9 = vpack.c.bf16 %v1990_v60, %v1988_v18  ;;  %v1994_v28 = vadd.f32 %v1993_v27, %v1834_v12 }
 0x589   : > { %v1995_v30 = vpop.f32.mrf.mxu0 }
 0x58a   : > { %2135 = vst [vmem:[%s3221_s29 + $0x38] sm:$0xff] %v2307_v9  ;;  %v1996_v25 = vadd.f32 %v1995_v30, %v1834_v12 }
 0x58b   : > { %v1997_v59 = vpop.f32.mrf.mxu0 }
 0x58c   : > { %v2308_v56 = vpack.c.bf16 %v1996_v25, %v1994_v28  ;;  %v1998_v57 = vadd.f32 %v1997_v59, %v1839_v19 }
 0x58d   : > { %v1999_v45 = vpop.f32.mrf.mxu0 }
 0x58e   : > { %2136 = vst [vmem:[%s3221_s29 + $0x40] sm:$0xff] %v2308_v56  ;;  %v2000_v49 = vadd.f32 %v1999_v45, %v1839_v19 }
 0x58f   : > { %v2003_v14 = vpop.f32.mrf.mxu0 }
 0x590   : > { %v2309_v62 = vpack.c.bf16 %v2000_v49, %v1998_v57  ;;  %v2004_v3 = vadd.f32 %v2003_v14, %v1844_v0 }
 0x591   : > { %v2005_v41 = vpop.f32.mrf.mxu0 }
 0x592   : > { %2137 = vst [vmem:[%s3221_s29 + $0x48] sm:$0xff] %v2309_v62  ;;  %v2006_v43 = vadd.f32 %v2005_v41, %v1844_v0 }
 0x593   : > { %v2007_v4 = vpop.f32.mrf.mxu0 }
 0x594   : > { %v2310_v6 = vpack.c.bf16 %v2006_v43, %v2004_v3  ;;  %v2008_v20 = vadd.f32 %v2007_v4, %v1849_v61 }
 0x595   : > { %v2009_v39 = vpop.f32.mrf.mxu0 }
 0x596   : > { %2138 = vst [vmem:[%s3221_s29 + $0x50] sm:$0xff] %v2310_v6  ;;  %v2010_v2 = vadd.f32 %v2009_v39, %v1849_v61 }
 0x597   : > { %v2013_v8 = vpop.f32.mrf.mxu0 }
 0x598   : > { %v2311_v33 = vpack.c.bf16 %v2010_v2, %v2008_v20  ;;  %v2014_v1 = vadd.f32 %v2013_v8, %v1854_v7 }
 0x599   : > { %v2015_v31 = vpop.f32.mrf.mxu0 }
 0x59a   : > { %2139 = vst [vmem:[%s3221_s29 + $0x58] sm:$0xff] %v2311_v33  ;;  %v2016_v34 = vadd.f32 %v2015_v31, %v1854_v7 }
 0x59b   : > { %v2017_v63 = vpop.f32.mrf.mxu0 }
 0x59c   : > { %v2312_v51 = vpack.c.bf16 %v2016_v34, %v2014_v1  ;;  %v2018_v46 = vadd.f32 %v2017_v63, %v1859_v36 }
 0x59d   : > { %v2019_v22 = vpop.f32.mrf.mxu0 }
 0x59e   : > { %2140 = vst [vmem:[%s3221_s29 + $0x60] sm:$0xff] %v2312_v51  ;;  %v2020_v54 = vadd.f32 %v2019_v22, %v1859_v36 }
 0x59f   : > { %v2023_v40 = vpop.f32.mrf.mxu0 }
 0x5a0   : > { %v2313_v47 = vpack.c.bf16 %v2020_v54, %v2018_v46  ;;  %v2024_v15 = vadd.f32 %v2023_v40, %v1864_v32 }
 0x5a1   : > { %v2025_v10 = vpop.f32.mrf.mxu0 }
 0x5a2   : > { %2141 = vst [vmem:[%s3221_s29 + $0x68] sm:$0xff] %v2313_v47  ;;  %v2026_v21 = vadd.f32 %v2025_v10, %v1864_v32 }
 0x5a3   : > { %v2027_v48 = vpop.f32.mrf.mxu0 }
 0x5a4   : > { %v2314_v24 = vpack.c.bf16 %v2026_v21, %v2024_v15  ;;  %v2028_v23 = vadd.f32 %v2027_v48, %v1869_v11 }
 0x5a5   : > { %v2029_v42 = vpop.f32.mrf.mxu0 }
 0x5a6   : > { %2142 = vst [vmem:[%s3221_s29 + $0x70] sm:$0xff] %v2314_v24  ;;  %v2030_v52 = vadd.f32 %v2029_v42, %v1869_v11 }
 0x5a8   : > { %v2315_v37 = vpack.c.bf16 %v2030_v52, %v2028_v23 }
 0x5aa   : > { %2143 = vst [vmem:[%s3221_s29 + $0x78] sm:$0xff] %v2315_v37 }
 0x5ab PF: > { %s21_s19 = sadd.s32 1, %s2421_s19   ;;  %s3260_s17 = smov %s2417_s18 }
 0x5ac   : > { %p18_p5 = scmp.ge.s32.totalorder %s21_s19, 4   ;;  %s3261_s18 = smov %s3263_s20 }
 0x5ae   :  { %20 = sbr.rel (!%p18_p5) target bundleno = 2 (0x2), region = 94 }

</bundles_post_ra>
